<compile_context>
chip_gen: v5e
topology: v5e:2x2
jax: 0.10.0
libtpu: 0.0.40
codegen_flags: <defaults>
</compile_context>

<pallas_src>
import functools

import jax
import jax.numpy as jnp
from jax.experimental import pallas as pl
from jax.experimental.pallas import tpu as pltpu


# Fully unroll the time recurrence for short sequences; lax.fori_loop otherwise.
_STATIC_UNROLL_MAX_T = 64


def _encoder_lstm_kernel(*refs, num_layers, hidden_dim, seq_len, batch):
    """Fused multi-layer LSTM forward.

    refs layout:
      refs[0]                         x_rows  (T*B, I)   time-major rows, f32
      refs[1 + 3*l : 4 + 3*l]         (w_ih (in,4H) bf16, w_hh (H,4H) bf16,
                                       bias (1,4H) f32) for layer l
      refs[1+3L : 4+3L]               out_rows (T*B, H), h_n (L,B,H), c_n (L,B,H)
      refs[4+3L :]                    act0 (T*B,H) f32, act1 (T*B,H) f32,
                                      xg_sc (T*B,4H) f32
    Row index convention everywhere: row = t * B + b.
    """
    H, T, B = hidden_dim, seq_len, batch
    x_ref = refs[0]
    layer_refs = [refs[1 + 3 * l: 4 + 3 * l] for l in range(num_layers)]
    out_ref, hN_ref, cN_ref = refs[1 + 3 * num_layers: 4 + 3 * num_layers]
    act_sc = refs[4 + 3 * num_layers: 6 + 3 * num_layers]   # ping-pong pair
    xg_sc = refs[6 + 3 * num_layers]

    src = x_ref                                  # input rows of current layer
    for layer, (wih_ref, whh_ref, b_ref) in enumerate(layer_refs):
        # Last layer writes straight into the kernel output; earlier layers
        # write into alternating inter-layer activation scratch slabs (no
        # read/write aliasing of the same slab within a layer).
        dst = out_ref if layer == num_layers - 1 else act_sc[layer % 2]

        # ---- Hoisted input projection: ONE big MXU matmul for all T*B rows.
        # bf16 operands, f32 accumulation, bias (b_ih + b_hh) folded in.
        xg_sc[...] = (
            jnp.dot(src[...].astype(jnp.bfloat16), wih_ref[...],
                    preferred_element_type=jnp.float32)
            + b_ref[...])                         # (1, 4H) broadcasts

        whh = whh_ref[...]                        # (H, 4H) bf16, hoisted once

        def step(row, h, c):
            # row is a Python int (static unroll) or a traced, hinted index.
            g = xg_sc[pl.ds(row, B), :] + jnp.dot(
                h.astype(jnp.bfloat16), whh,
                preferred_element_type=jnp.float32)           # (B, 4H) f32
            # PyTorch gate order: i, f, g, o.  At H a multiple of 128 these
            # slices are lane-aligned; at the demo H=32 they are cheap masked
            # lane extracts within a single vreg.
            i_g = jax.nn.sigmoid(g[:, 0 * H:1 * H])
            f_g = jax.nn.sigmoid(g[:, 1 * H:2 * H])
            g_g = jnp.tanh(g[:, 2 * H:3 * H])
            o_g = jax.nn.sigmoid(g[:, 3 * H:4 * H])
            c_new = f_g * c + i_g * g_g
            h_new = o_g * jnp.tanh(c_new)
            dst[pl.ds(row, B), :] = h_new
            return h_new, c_new

        # h/c carried as f32 values (vreg-resident), not scratch.
        h = jnp.zeros((B, H), jnp.float32)
        c = jnp.zeros((B, H), jnp.float32)
        if T <= _STATIC_UNROLL_MAX_T:
            for t in range(T):                   # static unroll: static slices
                h, c = step(t * B, h, c)
        else:
            def body(t, hc):
                row = pl.multiple_of(t * B, B)   # alignment hint for pl.ds
                return step(row, *hc)
            h, c = jax.lax.fori_loop(0, T, body, (h, c))

        hN_ref[layer] = h
        cN_ref[layer] = c
        src = dst                                 # this layer's output -> next


def encoder_lstm_forward(x_bti, params, hidden_dim):
    """x_bti: (B, T, input_size) batch_first, f32.
    params: list of (w_ih (in, 4H), w_hh (H, 4H), bias (1, 4H)) per layer, f32.
    Returns output (B, T, H) and (h_n, c_n) each (L, B, H)."""
    B, T, I = x_bti.shape
    L, H = len(params), hidden_dim

    # Single fused host-side layout op: batch-first -> time-major row slab so
    # the kernel only ever touches dense 2-D row ranges (row = t*B + b).
    x_rows = jnp.transpose(x_bti, (1, 0, 2)).reshape(T * B, I)

    flat_weights = []
    for (w_ih, w_hh, bias) in params:
        flat_weights += [w_ih.astype(jnp.bfloat16),   # bf16 operands for the MXU
                         w_hh.astype(jnp.bfloat16),
                         bias]                        # bias stays f32

    kernel = functools.partial(_encoder_lstm_kernel, num_layers=L,
                               hidden_dim=H, seq_len=T, batch=B)
    vmem = pl.BlockSpec(memory_space=pltpu.MemorySpace.VMEM)

    # Rough VMEM budget (inputs + outputs + scratch); give the compiler
    # headroom but never ask for more than the smallest physical VMEM (64 MiB).
    weight_bytes = sum(int(w.size) * w.dtype.itemsize for w in flat_weights)
    slab_bytes = 4 * (T * B) * (I + H + 2 * H + 4 * H + L and 1)  # keep simple
    slab_bytes = 4 * (T * B) * (I + 3 * H + 4 * H) + 4 * 2 * L * B * H
    need = weight_bytes + slab_bytes
    vmem_limit = int(min(64 * 1024 * 1024, max(32 * 1024 * 1024, 2 * need)))

    out_rows, h_n, c_n = pl.pallas_call(
        kernel,
        out_shape=(
            jax.ShapeDtypeStruct((T * B, H), jnp.float32),   # output rows
            jax.ShapeDtypeStruct((L, B, H), jnp.float32),    # h_n
            jax.ShapeDtypeStruct((L, B, H), jnp.float32),    # c_n
        ),
        in_specs=[vmem] * (1 + 3 * L),
        out_specs=(vmem, vmem, vmem),
        scratch_shapes=[
            pltpu.VMEM((T * B, H), jnp.float32),       # inter-layer acts (ping)
            pltpu.VMEM((T * B, H), jnp.float32),       # inter-layer acts (pong)
            pltpu.VMEM((T * B, 4 * H), jnp.float32),   # hoisted gate projections
        ],
        compiler_params=pltpu.CompilerParams(vmem_limit_bytes=vmem_limit),
    )(x_rows, *flat_weights)

    output = jnp.transpose(out_rows.reshape(T, B, H), (1, 0, 2))   # (B, T, H)
    return output, (h_n, c_n)


class EncoderRNN:
    """JAX/Pallas port of the PyTorch EncoderRNN (multi-layer LSTM, batch_first)."""

    def __init__(self, input_size, hidden_size, hidden_dim, num_layers, key):
        self.input_size = input_size
        self.hidden_size = hidden_size   # unused by forward, kept for parity
        self.hidden_dim = hidden_dim
        self.num_layers = num_layers

        # Deterministic init matching PyTorch LSTM U(-1/sqrt(H), 1/sqrt(H)).
        bound = 1.0 / (hidden_dim ** 0.5)
        self.params = []
        for layer in range(num_layers):
            in_dim = input_size if layer == 0 else hidden_dim
            key, k1, k2, k3, k4 = jax.random.split(key, 5)
            # Stored transposed (in, 4H) so the kernel does x @ W directly.
            w_ih = jax.random.uniform(k1, (in_dim, 4 * hidden_dim),
                                      jnp.float32, -bound, bound)
            w_hh = jax.random.uniform(k2, (hidden_dim, 4 * hidden_dim),
                                      jnp.float32, -bound, bound)
            b_ih = jax.random.uniform(k3, (4 * hidden_dim,),
                                      jnp.float32, -bound, bound)
            b_hh = jax.random.uniform(k4, (4 * hidden_dim,),
                                      jnp.float32, -bound, bound)
            bias = (b_ih + b_hh).reshape(1, 4 * hidden_dim)
            self.params.append((w_ih, w_hh, bias))

    def __call__(self, x_bti):
        # Matches nn.LSTM(batch_first=True): returns (output, (h_n, c_n)).
        return encoder_lstm_forward(x_bti, self.params, self.hidden_dim)


def _lstm_reference(x_bti, params, hidden_dim):
    """Pure-JAX reference (lax.scan) mirroring the kernel's bf16-matmul/f32-acc
    numerics for the correctness check."""
    B = x_bti.shape[0]
    H = hidden_dim
    x = jnp.transpose(x_bti, (1, 0, 2))          # (T, B, in)
    h_list, c_list = [], []
    for (w_ih, w_hh, bias) in params:
        w_ih_bf = w_ih.astype(jnp.bfloat16)
        w_hh_bf = w_hh.astype(jnp.bfloat16)
        h0 = jnp.zeros((B, H), jnp.float32)
        c0 = jnp.zeros((B, H), jnp.float32)

        def step(carry, x_t):
            h, c = carry
            g = (jnp.dot(x_t.astype(jnp.bfloat16), w_ih_bf,
                         preferred_element_type=jnp.float32)
                 + jnp.dot(h.astype(jnp.bfloat16), w_hh_bf,
                           preferred_element_type=jnp.float32)
                 + bias)
            i = jax.nn.sigmoid(g[:, :H])
            f = jax.nn.sigmoid(g[:, H:2 * H])
            gg = jnp.tanh(g[:, 2 * H:3 * H])
            o = jax.nn.sigmoid(g[:, 3 * H:])
            c = f * c + i * gg
            h = o * jnp.tanh(c)
            return (h, c), h

        (h_n, c_n), ys = jax.lax.scan(step, (h0, c0), x)
        x = ys
        h_list.append(h_n)
        c_list.append(c_n)
    return (jnp.transpose(x, (1, 0, 2)),
            (jnp.stack(h_list, 0), jnp.stack(c_list, 0)))


if __name__ == "__main__":
    key = jax.random.PRNGKey(0)
    k_param, k_input = jax.random.split(key)

    batch, seq, input_size = 2, 8, 8
    hidden_dim, num_layers = 32, 2

    model = EncoderRNN(input_size=input_size, hidden_size=hidden_dim,
                       hidden_dim=hidden_dim, num_layers=num_layers,
                       key=k_param)

    x = jax.random.normal(k_input, (batch, seq, input_size), jnp.float32)

    output, (h_n, c_n) = model(x)
    jax.block_until_ready((output, h_n, c_n))

    ref_out, (ref_h, ref_c) = _lstm_reference(x, model.params, hidden_dim)
    assert output.shape == (batch, seq, hidden_dim)
    assert h_n.shape == (num_layers, batch, hidden_dim)
    assert c_n.shape == (num_layers, batch, hidden_dim)
    assert jnp.allclose(output, ref_out, atol=2e-3), \
        float(jnp.max(jnp.abs(output - ref_out)))
    assert jnp.allclose(h_n, ref_h, atol=2e-3)
    assert jnp.allclose(c_n, ref_c, atol=2e-3)

    print("KERNEL_OK")
</pallas_src>

<mosaic_0001>
module attributes {stable_mosaic.version = 11 : i64} {
  func.func @_encoder_lstm_kernel(%arg0: memref<16x8xf32, #tpu.memory_space<vmem>>, %arg1: memref<8x128xbf16, #tpu.memory_space<vmem>>, %arg2: memref<32x128xbf16, #tpu.memory_space<vmem>>, %arg3: memref<1x128xf32, #tpu.memory_space<vmem>>, %arg4: memref<32x128xbf16, #tpu.memory_space<vmem>>, %arg5: memref<32x128xbf16, #tpu.memory_space<vmem>>, %arg6: memref<1x128xf32, #tpu.memory_space<vmem>>, %arg7: memref<16x32xf32, #tpu.memory_space<vmem>>, %arg8: memref<2x2x32xf32, #tpu.memory_space<vmem>>, %arg9: memref<2x2x32xf32, #tpu.memory_space<vmem>>, %arg10: memref<16x32xf32, #tpu.memory_space<vmem>>, %arg11: memref<16x32xf32, #tpu.memory_space<vmem>>, %arg12: memref<16x128xf32, #tpu.memory_space<vmem>>) attributes {dimension_semantics = [], scalar_prefetch = 0 : i64, scratch_operands = 3 : i64, tpu.core_type = #tpu.core_type<tc>} {
    %c0 = arith.constant 0 : index
    %c0_0 = arith.constant 0 : index
    %0 = vector.load %arg0[%c0, %c0_0] : memref<16x8xf32, #tpu.memory_space<vmem>>, vector<16x8xf32>
    %1 = arith.truncf %0 : vector<16x8xf32> to vector<16x8xbf16>
    %c0_1 = arith.constant 0 : index
    %c0_2 = arith.constant 0 : index
    %2 = vector.load %arg1[%c0_1, %c0_2] : memref<8x128xbf16, #tpu.memory_space<vmem>>, vector<8x128xbf16>
    %cst = arith.constant dense<0.000000e+00> : vector<16x128xf32>
    %3 = tpu.matmul %1, %2, %cst {dimension_numbers = #tpu.dot_dimension_numbers<[1], [0], [0], [1], [0, 0, 1, 1], [], []>} : vector<16x8xbf16>, vector<8x128xbf16>, vector<16x128xf32> -> vector<16x128xf32>
    %c0_3 = arith.constant 0 : index
    %c0_4 = arith.constant 0 : index
    %4 = vector.load %arg3[%c0_3, %c0_4] : memref<1x128xf32, #tpu.memory_space<vmem>>, vector<1x128xf32>
    %5 = vector.broadcast %4 : vector<1x128xf32> to vector<16x128xf32>
    %6 = arith.addf %3, %5 : vector<16x128xf32>
    %c0_5 = arith.constant 0 : index
    %c0_6 = arith.constant 0 : index
    %7 = vector.load %arg12[%c0_5, %c0_6] : memref<16x128xf32, #tpu.memory_space<vmem>>, vector<16x128xf32>
    tpu.vector_store %arg12[%c0_5, %c0_6], %6 {strides = array<i32>} : memref<16x128xf32, #tpu.memory_space<vmem>>, vector<16x128xf32>,
    %c0_7 = arith.constant 0 : index
    %c0_8 = arith.constant 0 : index
    %8 = vector.load %arg2[%c0_7, %c0_8] : memref<32x128xbf16, #tpu.memory_space<vmem>>, vector<32x128xbf16>
    %cst_9 = arith.constant 0.000000e+00 : f32
    %9 = vector.broadcast %cst_9 : f32 to vector<2x32xf32>
    %cst_10 = arith.constant 0.000000e+00 : f32
    %10 = vector.broadcast %cst_10 : f32 to vector<2x32xf32>
    %c0_11 = arith.constant 0 : index
    %c0_12 = arith.constant 0 : index
    %11 = vector.load %arg12[%c0_11, %c0_12] : memref<16x128xf32, #tpu.memory_space<vmem>>, vector<2x128xf32>
    %12 = arith.truncf %9 : vector<2x32xf32> to vector<2x32xbf16>
    %cst_13 = arith.constant dense<0.000000e+00> : vector<2x128xf32>
    %13 = tpu.matmul %12, %8, %cst_13 {dimension_numbers = #tpu.dot_dimension_numbers<[1], [0], [0], [1], [0, 0, 1, 1], [], []>} : vector<2x32xbf16>, vector<32x128xbf16>, vector<2x128xf32> -> vector<2x128xf32>
    %14 = arith.addf %11, %13 : vector<2x128xf32>
    %15 = vector.extract_strided_slice %14 {offsets = [0, 0], sizes = [2, 32], strides = [1, 1]} : vector<2x128xf32> to vector<2x32xf32>
    %16 = arith.negf %15 : vector<2x32xf32>
    %17 = math.exp %16 : vector<2x32xf32>
    %cst_14 = arith.constant 1.000000e+00 : f32
    %18 = vector.broadcast %cst_14 : f32 to vector<2x32xf32>
    %19 = arith.addf %18, %17 : vector<2x32xf32>
    %20 = arith.divf %18, %19 : vector<2x32xf32>
    %21 = vector.extract_strided_slice %14 {offsets = [0, 32], sizes = [2, 32], strides = [1, 1]} : vector<2x128xf32> to vector<2x32xf32>
    %22 = arith.negf %21 : vector<2x32xf32>
    %23 = math.exp %22 : vector<2x32xf32>
    %cst_15 = arith.constant 1.000000e+00 : f32
    %24 = vector.broadcast %cst_15 : f32 to vector<2x32xf32>
    %25 = arith.addf %24, %23 : vector<2x32xf32>
    %26 = arith.divf %24, %25 : vector<2x32xf32>
    %27 = vector.extract_strided_slice %14 {offsets = [0, 64], sizes = [2, 32], strides = [1, 1]} : vector<2x128xf32> to vector<2x32xf32>
    %28 = math.tanh %27 : vector<2x32xf32>
    %29 = vector.extract_strided_slice %14 {offsets = [0, 96], sizes = [2, 32], strides = [1, 1]} : vector<2x128xf32> to vector<2x32xf32>
    %30 = arith.negf %29 : vector<2x32xf32>
    %31 = math.exp %30 : vector<2x32xf32>
    %cst_16 = arith.constant 1.000000e+00 : f32
    %32 = vector.broadcast %cst_16 : f32 to vector<2x32xf32>
    %33 = arith.addf %32, %31 : vector<2x32xf32>
    %34 = arith.divf %32, %33 : vector<2x32xf32>
    %35 = arith.mulf %26, %10 : vector<2x32xf32>
    %36 = arith.mulf %20, %28 : vector<2x32xf32>
    %37 = arith.addf %35, %36 : vector<2x32xf32>
    %38 = math.tanh %37 : vector<2x32xf32>
    %39 = arith.mulf %34, %38 : vector<2x32xf32>
    %c0_17 = arith.constant 0 : index
    %c0_18 = arith.constant 0 : index
    %40 = vector.load %arg10[%c0_17, %c0_18] : memref<16x32xf32, #tpu.memory_space<vmem>>, vector<2x32xf32>
    tpu.vector_store %arg10[%c0_17, %c0_18], %39 {strides = array<i32>} : memref<16x32xf32, #tpu.memory_space<vmem>>, vector<2x32xf32>,
    %c2 = arith.constant 2 : index
    %c0_19 = arith.constant 0 : index
    %41 = vector.load %arg12[%c2, %c0_19] : memref<16x128xf32, #tpu.memory_space<vmem>>, vector<2x128xf32>
    %42 = arith.truncf %39 : vector<2x32xf32> to vector<2x32xbf16>
    %cst_20 = arith.constant dense<0.000000e+00> : vector<2x128xf32>
    %43 = tpu.matmul %42, %8, %cst_20 {dimension_numbers = #tpu.dot_dimension_numbers<[1], [0], [0], [1], [0, 0, 1, 1], [], []>} : vector<2x32xbf16>, vector<32x128xbf16>, vector<2x128xf32> -> vector<2x128xf32>
    %44 = arith.addf %41, %43 : vector<2x128xf32>
    %45 = vector.extract_strided_slice %44 {offsets = [0, 0], sizes = [2, 32], strides = [1, 1]} : vector<2x128xf32> to vector<2x32xf32>
    %46 = arith.negf %45 : vector<2x32xf32>
    %47 = math.exp %46 : vector<2x32xf32>
    %cst_21 = arith.constant 1.000000e+00 : f32
    %48 = vector.broadcast %cst_21 : f32 to vector<2x32xf32>
    %49 = arith.addf %48, %47 : vector<2x32xf32>
    %50 = arith.divf %48, %49 : vector<2x32xf32>
    %51 = vector.extract_strided_slice %44 {offsets = [0, 32], sizes = [2, 32], strides = [1, 1]} : vector<2x128xf32> to vector<2x32xf32>
    %52 = arith.negf %51 : vector<2x32xf32>
    %53 = math.exp %52 : vector<2x32xf32>
    %cst_22 = arith.constant 1.000000e+00 : f32
    %54 = vector.broadcast %cst_22 : f32 to vector<2x32xf32>
    %55 = arith.addf %54, %53 : vector<2x32xf32>
    %56 = arith.divf %54, %55 : vector<2x32xf32>
    %57 = vector.extract_strided_slice %44 {offsets = [0, 64], sizes = [2, 32], strides = [1, 1]} : vector<2x128xf32> to vector<2x32xf32>
    %58 = math.tanh %57 : vector<2x32xf32>
    %59 = vector.extract_strided_slice %44 {offsets = [0, 96], sizes = [2, 32], strides = [1, 1]} : vector<2x128xf32> to vector<2x32xf32>
    %60 = arith.negf %59 : vector<2x32xf32>
    %61 = math.exp %60 : vector<2x32xf32>
    %cst_23 = arith.constant 1.000000e+00 : f32
    %62 = vector.broadcast %cst_23 : f32 to vector<2x32xf32>
    %63 = arith.addf %62, %61 : vector<2x32xf32>
    %64 = arith.divf %62, %63 : vector<2x32xf32>
    %65 = arith.mulf %56, %37 : vector<2x32xf32>
    %66 = arith.mulf %50, %58 : vector<2x32xf32>
    %67 = arith.addf %65, %66 : vector<2x32xf32>
    %68 = math.tanh %67 : vector<2x32xf32>
    %69 = arith.mulf %64, %68 : vector<2x32xf32>
    %c2_24 = arith.constant 2 : index
    %c0_25 = arith.constant 0 : index
    %70 = vector.load %arg10[%c2_24, %c0_25] : memref<16x32xf32, #tpu.memory_space<vmem>>, vector<2x32xf32>
    tpu.vector_store %arg10[%c2_24, %c0_25], %69 {strides = array<i32>} : memref<16x32xf32, #tpu.memory_space<vmem>>, vector<2x32xf32>,
    %c4 = arith.constant 4 : index
    %c0_26 = arith.constant 0 : index
    %71 = vector.load %arg12[%c4, %c0_26] : memref<16x128xf32, #tpu.memory_space<vmem>>, vector<2x128xf32>
    %72 = arith.truncf %69 : vector<2x32xf32> to vector<2x32xbf16>
    %cst_27 = arith.constant dense<0.000000e+00> : vector<2x128xf32>
    %73 = tpu.matmul %72, %8, %cst_27 {dimension_numbers = #tpu.dot_dimension_numbers<[1], [0], [0], [1], [0, 0, 1, 1], [], []>} : vector<2x32xbf16>, vector<32x128xbf16>, vector<2x128xf32> -> vector<2x128xf32>
    %74 = arith.addf %71, %73 : vector<2x128xf32>
    %75 = vector.extract_strided_slice %74 {offsets = [0, 0], sizes = [2, 32], strides = [1, 1]} : vector<2x128xf32> to vector<2x32xf32>
    %76 = arith.negf %75 : vector<2x32xf32>
    %77 = math.exp %76 : vector<2x32xf32>
    %cst_28 = arith.constant 1.000000e+00 : f32
    %78 = vector.broadcast %cst_28 : f32 to vector<2x32xf32>
    %79 = arith.addf %78, %77 : vector<2x32xf32>
    %80 = arith.divf %78, %79 : vector<2x32xf32>
    %81 = vector.extract_strided_slice %74 {offsets = [0, 32], sizes = [2, 32], strides = [1, 1]} : vector<2x128xf32> to vector<2x32xf32>
    %82 = arith.negf %81 : vector<2x32xf32>
    %83 = math.exp %82 : vector<2x32xf32>
    %cst_29 = arith.constant 1.000000e+00 : f32
    %84 = vector.broadcast %cst_29 : f32 to vector<2x32xf32>
    %85 = arith.addf %84, %83 : vector<2x32xf32>
    %86 = arith.divf %84, %85 : vector<2x32xf32>
    %87 = vector.extract_strided_slice %74 {offsets = [0, 64], sizes = [2, 32], strides = [1, 1]} : vector<2x128xf32> to vector<2x32xf32>
    %88 = math.tanh %87 : vector<2x32xf32>
    %89 = vector.extract_strided_slice %74 {offsets = [0, 96], sizes = [2, 32], strides = [1, 1]} : vector<2x128xf32> to vector<2x32xf32>
    %90 = arith.negf %89 : vector<2x32xf32>
    %91 = math.exp %90 : vector<2x32xf32>
    %cst_30 = arith.constant 1.000000e+00 : f32
    %92 = vector.broadcast %cst_30 : f32 to vector<2x32xf32>
    %93 = arith.addf %92, %91 : vector<2x32xf32>
    %94 = arith.divf %92, %93 : vector<2x32xf32>
    %95 = arith.mulf %86, %67 : vector<2x32xf32>
    %96 = arith.mulf %80, %88 : vector<2x32xf32>
    %97 = arith.addf %95, %96 : vector<2x32xf32>
    %98 = math.tanh %97 : vector<2x32xf32>
    %99 = arith.mulf %94, %98 : vector<2x32xf32>
    %c4_31 = arith.constant 4 : index
    %c0_32 = arith.constant 0 : index
    %100 = vector.load %arg10[%c4_31, %c0_32] : memref<16x32xf32, #tpu.memory_space<vmem>>, vector<2x32xf32>
    tpu.vector_store %arg10[%c4_31, %c0_32], %99 {strides = array<i32>} : memref<16x32xf32, #tpu.memory_space<vmem>>, vector<2x32xf32>,
    %c6 = arith.constant 6 : index
    %c0_33 = arith.constant 0 : index
    %101 = vector.load %arg12[%c6, %c0_33] : memref<16x128xf32, #tpu.memory_space<vmem>>, vector<2x128xf32>
    %102 = arith.truncf %99 : vector<2x32xf32> to vector<2x32xbf16>
    %cst_34 = arith.constant dense<0.000000e+00> : vector<2x128xf32>
    %103 = tpu.matmul %102, %8, %cst_34 {dimension_numbers = #tpu.dot_dimension_numbers<[1], [0], [0], [1], [0, 0, 1, 1], [], []>} : vector<2x32xbf16>, vector<32x128xbf16>, vector<2x128xf32> -> vector<2x128xf32>
    %104 = arith.addf %101, %103 : vector<2x128xf32>
    %105 = vector.extract_strided_slice %104 {offsets = [0, 0], sizes = [2, 32], strides = [1, 1]} : vector<2x128xf32> to vector<2x32xf32>
    %106 = arith.negf %105 : vector<2x32xf32>
    %107 = math.exp %106 : vector<2x32xf32>
    %cst_35 = arith.constant 1.000000e+00 : f32
    %108 = vector.broadcast %cst_35 : f32 to vector<2x32xf32>
    %109 = arith.addf %108, %107 : vector<2x32xf32>
    %110 = arith.divf %108, %109 : vector<2x32xf32>
    %111 = vector.extract_strided_slice %104 {offsets = [0, 32], sizes = [2, 32], strides = [1, 1]} : vector<2x128xf32> to vector<2x32xf32>
    %112 = arith.negf %111 : vector<2x32xf32>
    %113 = math.exp %112 : vector<2x32xf32>
    %cst_36 = arith.constant 1.000000e+00 : f32
    %114 = vector.broadcast %cst_36 : f32 to vector<2x32xf32>
    %115 = arith.addf %114, %113 : vector<2x32xf32>
    %116 = arith.divf %114, %115 : vector<2x32xf32>
    %117 = vector.extract_strided_slice %104 {offsets = [0, 64], sizes = [2, 32], strides = [1, 1]} : vector<2x128xf32> to vector<2x32xf32>
    %118 = math.tanh %117 : vector<2x32xf32>
    %119 = vector.extract_strided_slice %104 {offsets = [0, 96], sizes = [2, 32], strides = [1, 1]} : vector<2x128xf32> to vector<2x32xf32>
    %120 = arith.negf %119 : vector<2x32xf32>
    %121 = math.exp %120 : vector<2x32xf32>
    %cst_37 = arith.constant 1.000000e+00 : f32
    %122 = vector.broadcast %cst_37 : f32 to vector<2x32xf32>
    %123 = arith.addf %122, %121 : vector<2x32xf32>
    %124 = arith.divf %122, %123 : vector<2x32xf32>
    %125 = arith.mulf %116, %97 : vector<2x32xf32>
    %126 = arith.mulf %110, %118 : vector<2x32xf32>
    %127 = arith.addf %125, %126 : vector<2x32xf32>
    %128 = math.tanh %127 : vector<2x32xf32>
    %129 = arith.mulf %124, %128 : vector<2x32xf32>
    %c6_38 = arith.constant 6 : index
    %c0_39 = arith.constant 0 : index
    %130 = vector.load %arg10[%c6_38, %c0_39] : memref<16x32xf32, #tpu.memory_space<vmem>>, vector<2x32xf32>
    tpu.vector_store %arg10[%c6_38, %c0_39], %129 {strides = array<i32>} : memref<16x32xf32, #tpu.memory_space<vmem>>, vector<2x32xf32>,
    %c8 = arith.constant 8 : index
    %c0_40 = arith.constant 0 : index
    %131 = vector.load %arg12[%c8, %c0_40] : memref<16x128xf32, #tpu.memory_space<vmem>>, vector<2x128xf32>
    %132 = arith.truncf %129 : vector<2x32xf32> to vector<2x32xbf16>
    %cst_41 = arith.constant dense<0.000000e+00> : vector<2x128xf32>
    %133 = tpu.matmul %132, %8, %cst_41 {dimension_numbers = #tpu.dot_dimension_numbers<[1], [0], [0], [1], [0, 0, 1, 1], [], []>} : vector<2x32xbf16>, vector<32x128xbf16>, vector<2x128xf32> -> vector<2x128xf32>
    %134 = arith.addf %131, %133 : vector<2x128xf32>
    %135 = vector.extract_strided_slice %134 {offsets = [0, 0], sizes = [2, 32], strides = [1, 1]} : vector<2x128xf32> to vector<2x32xf32>
    %136 = arith.negf %135 : vector<2x32xf32>
    %137 = math.exp %136 : vector<2x32xf32>
    %cst_42 = arith.constant 1.000000e+00 : f32
    %138 = vector.broadcast %cst_42 : f32 to vector<2x32xf32>
    %139 = arith.addf %138, %137 : vector<2x32xf32>
    %140 = arith.divf %138, %139 : vector<2x32xf32>
    %141 = vector.extract_strided_slice %134 {offsets = [0, 32], sizes = [2, 32], strides = [1, 1]} : vector<2x128xf32> to vector<2x32xf32>
    %142 = arith.negf %141 : vector<2x32xf32>
    %143 = math.exp %142 : vector<2x32xf32>
    %cst_43 = arith.constant 1.000000e+00 : f32
    %144 = vector.broadcast %cst_43 : f32 to vector<2x32xf32>
    %145 = arith.addf %144, %143 : vector<2x32xf32>
    %146 = arith.divf %144, %145 : vector<2x32xf32>
    %147 = vector.extract_strided_slice %134 {offsets = [0, 64], sizes = [2, 32], strides = [1, 1]} : vector<2x128xf32> to vector<2x32xf32>
    %148 = math.tanh %147 : vector<2x32xf32>
    %149 = vector.extract_strided_slice %134 {offsets = [0, 96], sizes = [2, 32], strides = [1, 1]} : vector<2x128xf32> to vector<2x32xf32>
    %150 = arith.negf %149 : vector<2x32xf32>
    %151 = math.exp %150 : vector<2x32xf32>
    %cst_44 = arith.constant 1.000000e+00 : f32
    %152 = vector.broadcast %cst_44 : f32 to vector<2x32xf32>
    %153 = arith.addf %152, %151 : vector<2x32xf32>
    %154 = arith.divf %152, %153 : vector<2x32xf32>
    %155 = arith.mulf %146, %127 : vector<2x32xf32>
    %156 = arith.mulf %140, %148 : vector<2x32xf32>
    %157 = arith.addf %155, %156 : vector<2x32xf32>
    %158 = math.tanh %157 : vector<2x32xf32>
    %159 = arith.mulf %154, %158 : vector<2x32xf32>
    %c8_45 = arith.constant 8 : index
    %c0_46 = arith.constant 0 : index
    %160 = vector.load %arg10[%c8_45, %c0_46] : memref<16x32xf32, #tpu.memory_space<vmem>>, vector<2x32xf32>
    tpu.vector_store %arg10[%c8_45, %c0_46], %159 {strides = array<i32>} : memref<16x32xf32, #tpu.memory_space<vmem>>, vector<2x32xf32>,
    %c10 = arith.constant 10 : index
    %c0_47 = arith.constant 0 : index
    %161 = vector.load %arg12[%c10, %c0_47] : memref<16x128xf32, #tpu.memory_space<vmem>>, vector<2x128xf32>
    %162 = arith.truncf %159 : vector<2x32xf32> to vector<2x32xbf16>
    %cst_48 = arith.constant dense<0.000000e+00> : vector<2x128xf32>
    %163 = tpu.matmul %162, %8, %cst_48 {dimension_numbers = #tpu.dot_dimension_numbers<[1], [0], [0], [1], [0, 0, 1, 1], [], []>} : vector<2x32xbf16>, vector<32x128xbf16>, vector<2x128xf32> -> vector<2x128xf32>
    %164 = arith.addf %161, %163 : vector<2x128xf32>
    %165 = vector.extract_strided_slice %164 {offsets = [0, 0], sizes = [2, 32], strides = [1, 1]} : vector<2x128xf32> to vector<2x32xf32>
    %166 = arith.negf %165 : vector<2x32xf32>
    %167 = math.exp %166 : vector<2x32xf32>
    %cst_49 = arith.constant 1.000000e+00 : f32
    %168 = vector.broadcast %cst_49 : f32 to vector<2x32xf32>
    %169 = arith.addf %168, %167 : vector<2x32xf32>
    %170 = arith.divf %168, %169 : vector<2x32xf32>
    %171 = vector.extract_strided_slice %164 {offsets = [0, 32], sizes = [2, 32], strides = [1, 1]} : vector<2x128xf32> to vector<2x32xf32>
    %172 = arith.negf %171 : vector<2x32xf32>
    %173 = math.exp %172 : vector<2x32xf32>
    %cst_50 = arith.constant 1.000000e+00 : f32
    %174 = vector.broadcast %cst_50 : f32 to vector<2x32xf32>
    %175 = arith.addf %174, %173 : vector<2x32xf32>
    %176 = arith.divf %174, %175 : vector<2x32xf32>
    %177 = vector.extract_strided_slice %164 {offsets = [0, 64], sizes = [2, 32], strides = [1, 1]} : vector<2x128xf32> to vector<2x32xf32>
    %178 = math.tanh %177 : vector<2x32xf32>
    %179 = vector.extract_strided_slice %164 {offsets = [0, 96], sizes = [2, 32], strides = [1, 1]} : vector<2x128xf32> to vector<2x32xf32>
    %180 = arith.negf %179 : vector<2x32xf32>
    %181 = math.exp %180 : vector<2x32xf32>
    %cst_51 = arith.constant 1.000000e+00 : f32
    %182 = vector.broadcast %cst_51 : f32 to vector<2x32xf32>
    %183 = arith.addf %182, %181 : vector<2x32xf32>
    %184 = arith.divf %182, %183 : vector<2x32xf32>
    %185 = arith.mulf %176, %157 : vector<2x32xf32>
    %186 = arith.mulf %170, %178 : vector<2x32xf32>
    %187 = arith.addf %185, %186 : vector<2x32xf32>
    %188 = math.tanh %187 : vector<2x32xf32>
    %189 = arith.mulf %184, %188 : vector<2x32xf32>
    %c10_52 = arith.constant 10 : index
    %c0_53 = arith.constant 0 : index
    %190 = vector.load %arg10[%c10_52, %c0_53] : memref<16x32xf32, #tpu.memory_space<vmem>>, vector<2x32xf32>
    tpu.vector_store %arg10[%c10_52, %c0_53], %189 {strides = array<i32>} : memref<16x32xf32, #tpu.memory_space<vmem>>, vector<2x32xf32>,
    %c12 = arith.constant 12 : index
    %c0_54 = arith.constant 0 : index
    %191 = vector.load %arg12[%c12, %c0_54] : memref<16x128xf32, #tpu.memory_space<vmem>>, vector<2x128xf32>
    %192 = arith.truncf %189 : vector<2x32xf32> to vector<2x32xbf16>
    %cst_55 = arith.constant dense<0.000000e+00> : vector<2x128xf32>
    %193 = tpu.matmul %192, %8, %cst_55 {dimension_numbers = #tpu.dot_dimension_numbers<[1], [0], [0], [1], [0, 0, 1, 1], [], []>} : vector<2x32xbf16>, vector<32x128xbf16>, vector<2x128xf32> -> vector<2x128xf32>
    %194 = arith.addf %191, %193 : vector<2x128xf32>
    %195 = vector.extract_strided_slice %194 {offsets = [0, 0], sizes = [2, 32], strides = [1, 1]} : vector<2x128xf32> to vector<2x32xf32>
    %196 = arith.negf %195 : vector<2x32xf32>
    %197 = math.exp %196 : vector<2x32xf32>
    %cst_56 = arith.constant 1.000000e+00 : f32
    %198 = vector.broadcast %cst_56 : f32 to vector<2x32xf32>
    %199 = arith.addf %198, %197 : vector<2x32xf32>
    %200 = arith.divf %198, %199 : vector<2x32xf32>
    %201 = vector.extract_strided_slice %194 {offsets = [0, 32], sizes = [2, 32], strides = [1, 1]} : vector<2x128xf32> to vector<2x32xf32>
    %202 = arith.negf %201 : vector<2x32xf32>
    %203 = math.exp %202 : vector<2x32xf32>
    %cst_57 = arith.constant 1.000000e+00 : f32
    %204 = vector.broadcast %cst_57 : f32 to vector<2x32xf32>
    %205 = arith.addf %204, %203 : vector<2x32xf32>
    %206 = arith.divf %204, %205 : vector<2x32xf32>
    %207 = vector.extract_strided_slice %194 {offsets = [0, 64], sizes = [2, 32], strides = [1, 1]} : vector<2x128xf32> to vector<2x32xf32>
    %208 = math.tanh %207 : vector<2x32xf32>
    %209 = vector.extract_strided_slice %194 {offsets = [0, 96], sizes = [2, 32], strides = [1, 1]} : vector<2x128xf32> to vector<2x32xf32>
    %210 = arith.negf %209 : vector<2x32xf32>
    %211 = math.exp %210 : vector<2x32xf32>
    %cst_58 = arith.constant 1.000000e+00 : f32
    %212 = vector.broadcast %cst_58 : f32 to vector<2x32xf32>
    %213 = arith.addf %212, %211 : vector<2x32xf32>
    %214 = arith.divf %212, %213 : vector<2x32xf32>
    %215 = arith.mulf %206, %187 : vector<2x32xf32>
    %216 = arith.mulf %200, %208 : vector<2x32xf32>
    %217 = arith.addf %215, %216 : vector<2x32xf32>
    %218 = math.tanh %217 : vector<2x32xf32>
    %219 = arith.mulf %214, %218 : vector<2x32xf32>
    %c12_59 = arith.constant 12 : index
    %c0_60 = arith.constant 0 : index
    %220 = vector.load %arg10[%c12_59, %c0_60] : memref<16x32xf32, #tpu.memory_space<vmem>>, vector<2x32xf32>
    tpu.vector_store %arg10[%c12_59, %c0_60], %219 {strides = array<i32>} : memref<16x32xf32, #tpu.memory_space<vmem>>, vector<2x32xf32>,
    %c14 = arith.constant 14 : index
    %c0_61 = arith.constant 0 : index
    %221 = vector.load %arg12[%c14, %c0_61] : memref<16x128xf32, #tpu.memory_space<vmem>>, vector<2x128xf32>
    %222 = arith.truncf %219 : vector<2x32xf32> to vector<2x32xbf16>
    %cst_62 = arith.constant dense<0.000000e+00> : vector<2x128xf32>
    %223 = tpu.matmul %222, %8, %cst_62 {dimension_numbers = #tpu.dot_dimension_numbers<[1], [0], [0], [1], [0, 0, 1, 1], [], []>} : vector<2x32xbf16>, vector<32x128xbf16>, vector<2x128xf32> -> vector<2x128xf32>
    %224 = arith.addf %221, %223 : vector<2x128xf32>
    %225 = vector.extract_strided_slice %224 {offsets = [0, 0], sizes = [2, 32], strides = [1, 1]} : vector<2x128xf32> to vector<2x32xf32>
    %226 = arith.negf %225 : vector<2x32xf32>
    %227 = math.exp %226 : vector<2x32xf32>
    %cst_63 = arith.constant 1.000000e+00 : f32
    %228 = vector.broadcast %cst_63 : f32 to vector<2x32xf32>
    %229 = arith.addf %228, %227 : vector<2x32xf32>
    %230 = arith.divf %228, %229 : vector<2x32xf32>
    %231 = vector.extract_strided_slice %224 {offsets = [0, 32], sizes = [2, 32], strides = [1, 1]} : vector<2x128xf32> to vector<2x32xf32>
    %232 = arith.negf %231 : vector<2x32xf32>
    %233 = math.exp %232 : vector<2x32xf32>
    %cst_64 = arith.constant 1.000000e+00 : f32
    %234 = vector.broadcast %cst_64 : f32 to vector<2x32xf32>
    %235 = arith.addf %234, %233 : vector<2x32xf32>
    %236 = arith.divf %234, %235 : vector<2x32xf32>
    %237 = vector.extract_strided_slice %224 {offsets = [0, 64], sizes = [2, 32], strides = [1, 1]} : vector<2x128xf32> to vector<2x32xf32>
    %238 = math.tanh %237 : vector<2x32xf32>
    %239 = vector.extract_strided_slice %224 {offsets = [0, 96], sizes = [2, 32], strides = [1, 1]} : vector<2x128xf32> to vector<2x32xf32>
    %240 = arith.negf %239 : vector<2x32xf32>
    %241 = math.exp %240 : vector<2x32xf32>
    %cst_65 = arith.constant 1.000000e+00 : f32
    %242 = vector.broadcast %cst_65 : f32 to vector<2x32xf32>
    %243 = arith.addf %242, %241 : vector<2x32xf32>
    %244 = arith.divf %242, %243 : vector<2x32xf32>
    %245 = arith.mulf %236, %217 : vector<2x32xf32>
    %246 = arith.mulf %230, %238 : vector<2x32xf32>
    %247 = arith.addf %245, %246 : vector<2x32xf32>
    %248 = math.tanh %247 : vector<2x32xf32>
    %249 = arith.mulf %244, %248 : vector<2x32xf32>
    %c14_66 = arith.constant 14 : index
    %c0_67 = arith.constant 0 : index
    %250 = vector.load %arg10[%c14_66, %c0_67] : memref<16x32xf32, #tpu.memory_space<vmem>>, vector<2x32xf32>
    tpu.vector_store %arg10[%c14_66, %c0_67], %249 {strides = array<i32>} : memref<16x32xf32, #tpu.memory_space<vmem>>, vector<2x32xf32>,
    %c0_68 = arith.constant 0 : index
    %c0_69 = arith.constant 0 : index
    %c0_70 = arith.constant 0 : index
    %251 = vector.load %arg8[%c0_68, %c0_69, %c0_70] : memref<2x2x32xf32, #tpu.memory_space<vmem>>, vector<1x2x32xf32>
    %252 = vector.shape_cast %251 : vector<1x2x32xf32> to vector<2x32xf32>
    %253 = vector.shape_cast %249 : vector<2x32xf32> to vector<1x2x32xf32>
    tpu.vector_store %arg8[%c0_68, %c0_69, %c0_70], %253 {strides = array<i32>} : memref<2x2x32xf32, #tpu.memory_space<vmem>>, vector<1x2x32xf32>,
    %c0_71 = arith.constant 0 : index
    %c0_72 = arith.constant 0 : index
    %c0_73 = arith.constant 0 : index
    %254 = vector.load %arg9[%c0_71, %c0_72, %c0_73] : memref<2x2x32xf32, #tpu.memory_space<vmem>>, vector<1x2x32xf32>
    %255 = vector.shape_cast %254 : vector<1x2x32xf32> to vector<2x32xf32>
    %256 = vector.shape_cast %247 : vector<2x32xf32> to vector<1x2x32xf32>
    tpu.vector_store %arg9[%c0_71, %c0_72, %c0_73], %256 {strides = array<i32>} : memref<2x2x32xf32, #tpu.memory_space<vmem>>, vector<1x2x32xf32>,
    %c0_74 = arith.constant 0 : index
    %c0_75 = arith.constant 0 : index
    %257 = vector.load %arg10[%c0_74, %c0_75] : memref<16x32xf32, #tpu.memory_space<vmem>>, vector<16x32xf32>
    %258 = arith.truncf %257 : vector<16x32xf32> to vector<16x32xbf16>
    %c0_76 = arith.constant 0 : index
    %c0_77 = arith.constant 0 : index
    %259 = vector.load %arg4[%c0_76, %c0_77] : memref<32x128xbf16, #tpu.memory_space<vmem>>, vector<32x128xbf16>
    %cst_78 = arith.constant dense<0.000000e+00> : vector<16x128xf32>
    %260 = tpu.matmul %258, %259, %cst_78 {dimension_numbers = #tpu.dot_dimension_numbers<[1], [0], [0], [1], [0, 0, 1, 1], [], []>} : vector<16x32xbf16>, vector<32x128xbf16>, vector<16x128xf32> -> vector<16x128xf32>
    %c0_79 = arith.constant 0 : index
    %c0_80 = arith.constant 0 : index
    %261 = vector.load %arg6[%c0_79, %c0_80] : memref<1x128xf32, #tpu.memory_space<vmem>>, vector<1x128xf32>
    %262 = vector.broadcast %261 : vector<1x128xf32> to vector<16x128xf32>
    %263 = arith.addf %260, %262 : vector<16x128xf32>
    %c0_81 = arith.constant 0 : index
    %c0_82 = arith.constant 0 : index
    %264 = vector.load %arg12[%c0_81, %c0_82] : memref<16x128xf32, #tpu.memory_space<vmem>>, vector<16x128xf32>
    tpu.vector_store %arg12[%c0_81, %c0_82], %263 {strides = array<i32>} : memref<16x128xf32, #tpu.memory_space<vmem>>, vector<16x128xf32>,
    %c0_83 = arith.constant 0 : index
    %c0_84 = arith.constant 0 : index
    %265 = vector.load %arg5[%c0_83, %c0_84] : memref<32x128xbf16, #tpu.memory_space<vmem>>, vector<32x128xbf16>
    %cst_85 = arith.constant 0.000000e+00 : f32
    %266 = vector.broadcast %cst_85 : f32 to vector<2x32xf32>
    %cst_86 = arith.constant 0.000000e+00 : f32
    %267 = vector.broadcast %cst_86 : f32 to vector<2x32xf32>
    %c0_87 = arith.constant 0 : index
    %c0_88 = arith.constant 0 : index
    %268 = vector.load %arg12[%c0_87, %c0_88] : memref<16x128xf32, #tpu.memory_space<vmem>>, vector<2x128xf32>
    %269 = arith.truncf %266 : vector<2x32xf32> to vector<2x32xbf16>
    %cst_89 = arith.constant dense<0.000000e+00> : vector<2x128xf32>
    %270 = tpu.matmul %269, %265, %cst_89 {dimension_numbers = #tpu.dot_dimension_numbers<[1], [0], [0], [1], [0, 0, 1, 1], [], []>} : vector<2x32xbf16>, vector<32x128xbf16>, vector<2x128xf32> -> vector<2x128xf32>
    %271 = arith.addf %268, %270 : vector<2x128xf32>
    %272 = vector.extract_strided_slice %271 {offsets = [0, 0], sizes = [2, 32], strides = [1, 1]} : vector<2x128xf32> to vector<2x32xf32>
    %273 = arith.negf %272 : vector<2x32xf32>
    %274 = math.exp %273 : vector<2x32xf32>
    %cst_90 = arith.constant 1.000000e+00 : f32
    %275 = vector.broadcast %cst_90 : f32 to vector<2x32xf32>
    %276 = arith.addf %275, %274 : vector<2x32xf32>
    %277 = arith.divf %275, %276 : vector<2x32xf32>
    %278 = vector.extract_strided_slice %271 {offsets = [0, 32], sizes = [2, 32], strides = [1, 1]} : vector<2x128xf32> to vector<2x32xf32>
    %279 = arith.negf %278 : vector<2x32xf32>
    %280 = math.exp %279 : vector<2x32xf32>
    %cst_91 = arith.constant 1.000000e+00 : f32
    %281 = vector.broadcast %cst_91 : f32 to vector<2x32xf32>
    %282 = arith.addf %281, %280 : vector<2x32xf32>
    %283 = arith.divf %281, %282 : vector<2x32xf32>
    %284 = vector.extract_strided_slice %271 {offsets = [0, 64], sizes = [2, 32], strides = [1, 1]} : vector<2x128xf32> to vector<2x32xf32>
    %285 = math.tanh %284 : vector<2x32xf32>
    %286 = vector.extract_strided_slice %271 {offsets = [0, 96], sizes = [2, 32], strides = [1, 1]} : vector<2x128xf32> to vector<2x32xf32>
    %287 = arith.negf %286 : vector<2x32xf32>
    %288 = math.exp %287 : vector<2x32xf32>
    %cst_92 = arith.constant 1.000000e+00 : f32
    %289 = vector.broadcast %cst_92 : f32 to vector<2x32xf32>
    %290 = arith.addf %289, %288 : vector<2x32xf32>
    %291 = arith.divf %289, %290 : vector<2x32xf32>
    %292 = arith.mulf %283, %267 : vector<2x32xf32>
    %293 = arith.mulf %277, %285 : vector<2x32xf32>
    %294 = arith.addf %292, %293 : vector<2x32xf32>
    %295 = math.tanh %294 : vector<2x32xf32>
    %296 = arith.mulf %291, %295 : vector<2x32xf32>
    %c0_93 = arith.constant 0 : index
    %c0_94 = arith.constant 0 : index
    %297 = vector.load %arg7[%c0_93, %c0_94] : memref<16x32xf32, #tpu.memory_space<vmem>>, vector<2x32xf32>
    tpu.vector_store %arg7[%c0_93, %c0_94], %296 {strides = array<i32>} : memref<16x32xf32, #tpu.memory_space<vmem>>, vector<2x32xf32>,
    %c2_95 = arith.constant 2 : index
    %c0_96 = arith.constant 0 : index
    %298 = vector.load %arg12[%c2_95, %c0_96] : memref<16x128xf32, #tpu.memory_space<vmem>>, vector<2x128xf32>
    %299 = arith.truncf %296 : vector<2x32xf32> to vector<2x32xbf16>
    %cst_97 = arith.constant dense<0.000000e+00> : vector<2x128xf32>
    %300 = tpu.matmul %299, %265, %cst_97 {dimension_numbers = #tpu.dot_dimension_numbers<[1], [0], [0], [1], [0, 0, 1, 1], [], []>} : vector<2x32xbf16>, vector<32x128xbf16>, vector<2x128xf32> -> vector<2x128xf32>
    %301 = arith.addf %298, %300 : vector<2x128xf32>
    %302 = vector.extract_strided_slice %301 {offsets = [0, 0], sizes = [2, 32], strides = [1, 1]} : vector<2x128xf32> to vector<2x32xf32>
    %303 = arith.negf %302 : vector<2x32xf32>
    %304 = math.exp %303 : vector<2x32xf32>
    %cst_98 = arith.constant 1.000000e+00 : f32
    %305 = vector.broadcast %cst_98 : f32 to vector<2x32xf32>
    %306 = arith.addf %305, %304 : vector<2x32xf32>
    %307 = arith.divf %305, %306 : vector<2x32xf32>
    %308 = vector.extract_strided_slice %301 {offsets = [0, 32], sizes = [2, 32], strides = [1, 1]} : vector<2x128xf32> to vector<2x32xf32>
    %309 = arith.negf %308 : vector<2x32xf32>
    %310 = math.exp %309 : vector<2x32xf32>
    %cst_99 = arith.constant 1.000000e+00 : f32
    %311 = vector.broadcast %cst_99 : f32 to vector<2x32xf32>
    %312 = arith.addf %311, %310 : vector<2x32xf32>
    %313 = arith.divf %311, %312 : vector<2x32xf32>
    %314 = vector.extract_strided_slice %301 {offsets = [0, 64], sizes = [2, 32], strides = [1, 1]} : vector<2x128xf32> to vector<2x32xf32>
    %315 = math.tanh %314 : vector<2x32xf32>
    %316 = vector.extract_strided_slice %301 {offsets = [0, 96], sizes = [2, 32], strides = [1, 1]} : vector<2x128xf32> to vector<2x32xf32>
    %317 = arith.negf %316 : vector<2x32xf32>
    %318 = math.exp %317 : vector<2x32xf32>
    %cst_100 = arith.constant 1.000000e+00 : f32
    %319 = vector.broadcast %cst_100 : f32 to vector<2x32xf32>
    %320 = arith.addf %319, %318 : vector<2x32xf32>
    %321 = arith.divf %319, %320 : vector<2x32xf32>
    %322 = arith.mulf %313, %294 : vector<2x32xf32>
    %323 = arith.mulf %307, %315 : vector<2x32xf32>
    %324 = arith.addf %322, %323 : vector<2x32xf32>
    %325 = math.tanh %324 : vector<2x32xf32>
    %326 = arith.mulf %321, %325 : vector<2x32xf32>
    %c2_101 = arith.constant 2 : index
    %c0_102 = arith.constant 0 : index
    %327 = vector.load %arg7[%c2_101, %c0_102] : memref<16x32xf32, #tpu.memory_space<vmem>>, vector<2x32xf32>
    tpu.vector_store %arg7[%c2_101, %c0_102], %326 {strides = array<i32>} : memref<16x32xf32, #tpu.memory_space<vmem>>, vector<2x32xf32>,
    %c4_103 = arith.constant 4 : index
    %c0_104 = arith.constant 0 : index
    %328 = vector.load %arg12[%c4_103, %c0_104] : memref<16x128xf32, #tpu.memory_space<vmem>>, vector<2x128xf32>
    %329 = arith.truncf %326 : vector<2x32xf32> to vector<2x32xbf16>
    %cst_105 = arith.constant dense<0.000000e+00> : vector<2x128xf32>
    %330 = tpu.matmul %329, %265, %cst_105 {dimension_numbers = #tpu.dot_dimension_numbers<[1], [0], [0], [1], [0, 0, 1, 1], [], []>} : vector<2x32xbf16>, vector<32x128xbf16>, vector<2x128xf32> -> vector<2x128xf32>
    %331 = arith.addf %328, %330 : vector<2x128xf32>
    %332 = vector.extract_strided_slice %331 {offsets = [0, 0], sizes = [2, 32], strides = [1, 1]} : vector<2x128xf32> to vector<2x32xf32>
    %333 = arith.negf %332 : vector<2x32xf32>
    %334 = math.exp %333 : vector<2x32xf32>
    %cst_106 = arith.constant 1.000000e+00 : f32
    %335 = vector.broadcast %cst_106 : f32 to vector<2x32xf32>
    %336 = arith.addf %335, %334 : vector<2x32xf32>
    %337 = arith.divf %335, %336 : vector<2x32xf32>
    %338 = vector.extract_strided_slice %331 {offsets = [0, 32], sizes = [2, 32], strides = [1, 1]} : vector<2x128xf32> to vector<2x32xf32>
    %339 = arith.negf %338 : vector<2x32xf32>
    %340 = math.exp %339 : vector<2x32xf32>
    %cst_107 = arith.constant 1.000000e+00 : f32
    %341 = vector.broadcast %cst_107 : f32 to vector<2x32xf32>
    %342 = arith.addf %341, %340 : vector<2x32xf32>
    %343 = arith.divf %341, %342 : vector<2x32xf32>
    %344 = vector.extract_strided_slice %331 {offsets = [0, 64], sizes = [2, 32], strides = [1, 1]} : vector<2x128xf32> to vector<2x32xf32>
    %345 = math.tanh %344 : vector<2x32xf32>
    %346 = vector.extract_strided_slice %331 {offsets = [0, 96], sizes = [2, 32], strides = [1, 1]} : vector<2x128xf32> to vector<2x32xf32>
    %347 = arith.negf %346 : vector<2x32xf32>
    %348 = math.exp %347 : vector<2x32xf32>
    %cst_108 = arith.constant 1.000000e+00 : f32
    %349 = vector.broadcast %cst_108 : f32 to vector<2x32xf32>
    %350 = arith.addf %349, %348 : vector<2x32xf32>
    %351 = arith.divf %349, %350 : vector<2x32xf32>
    %352 = arith.mulf %343, %324 : vector<2x32xf32>
    %353 = arith.mulf %337, %345 : vector<2x32xf32>
    %354 = arith.addf %352, %353 : vector<2x32xf32>
    %355 = math.tanh %354 : vector<2x32xf32>
    %356 = arith.mulf %351, %355 : vector<2x32xf32>
    %c4_109 = arith.constant 4 : index
    %c0_110 = arith.constant 0 : index
    %357 = vector.load %arg7[%c4_109, %c0_110] : memref<16x32xf32, #tpu.memory_space<vmem>>, vector<2x32xf32>
    tpu.vector_store %arg7[%c4_109, %c0_110], %356 {strides = array<i32>} : memref<16x32xf32, #tpu.memory_space<vmem>>, vector<2x32xf32>,
    %c6_111 = arith.constant 6 : index
    %c0_112 = arith.constant 0 : index
    %358 = vector.load %arg12[%c6_111, %c0_112] : memref<16x128xf32, #tpu.memory_space<vmem>>, vector<2x128xf32>
    %359 = arith.truncf %356 : vector<2x32xf32> to vector<2x32xbf16>
    %cst_113 = arith.constant dense<0.000000e+00> : vector<2x128xf32>
    %360 = tpu.matmul %359, %265, %cst_113 {dimension_numbers = #tpu.dot_dimension_numbers<[1], [0], [0], [1], [0, 0, 1, 1], [], []>} : vector<2x32xbf16>, vector<32x128xbf16>, vector<2x128xf32> -> vector<2x128xf32>
    %361 = arith.addf %358, %360 : vector<2x128xf32>
    %362 = vector.extract_strided_slice %361 {offsets = [0, 0], sizes = [2, 32], strides = [1, 1]} : vector<2x128xf32> to vector<2x32xf32>
    %363 = arith.negf %362 : vector<2x32xf32>
    %364 = math.exp %363 : vector<2x32xf32>
    %cst_114 = arith.constant 1.000000e+00 : f32
    %365 = vector.broadcast %cst_114 : f32 to vector<2x32xf32>
    %366 = arith.addf %365, %364 : vector<2x32xf32>
    %367 = arith.divf %365, %366 : vector<2x32xf32>
    %368 = vector.extract_strided_slice %361 {offsets = [0, 32], sizes = [2, 32], strides = [1, 1]} : vector<2x128xf32> to vector<2x32xf32>
    %369 = arith.negf %368 : vector<2x32xf32>
    %370 = math.exp %369 : vector<2x32xf32>
    %cst_115 = arith.constant 1.000000e+00 : f32
    %371 = vector.broadcast %cst_115 : f32 to vector<2x32xf32>
    %372 = arith.addf %371, %370 : vector<2x32xf32>
    %373 = arith.divf %371, %372 : vector<2x32xf32>
    %374 = vector.extract_strided_slice %361 {offsets = [0, 64], sizes = [2, 32], strides = [1, 1]} : vector<2x128xf32> to vector<2x32xf32>
    %375 = math.tanh %374 : vector<2x32xf32>
    %376 = vector.extract_strided_slice %361 {offsets = [0, 96], sizes = [2, 32], strides = [1, 1]} : vector<2x128xf32> to vector<2x32xf32>
    %377 = arith.negf %376 : vector<2x32xf32>
    %378 = math.exp %377 : vector<2x32xf32>
    %cst_116 = arith.constant 1.000000e+00 : f32
    %379 = vector.broadcast %cst_116 : f32 to vector<2x32xf32>
    %380 = arith.addf %379, %378 : vector<2x32xf32>
    %381 = arith.divf %379, %380 : vector<2x32xf32>
    %382 = arith.mulf %373, %354 : vector<2x32xf32>
    %383 = arith.mulf %367, %375 : vector<2x32xf32>
    %384 = arith.addf %382, %383 : vector<2x32xf32>
    %385 = math.tanh %384 : vector<2x32xf32>
    %386 = arith.mulf %381, %385 : vector<2x32xf32>
    %c6_117 = arith.constant 6 : index
    %c0_118 = arith.constant 0 : index
    %387 = vector.load %arg7[%c6_117, %c0_118] : memref<16x32xf32, #tpu.memory_space<vmem>>, vector<2x32xf32>
    tpu.vector_store %arg7[%c6_117, %c0_118], %386 {strides = array<i32>} : memref<16x32xf32, #tpu.memory_space<vmem>>, vector<2x32xf32>,
    %c8_119 = arith.constant 8 : index
    %c0_120 = arith.constant 0 : index
    %388 = vector.load %arg12[%c8_119, %c0_120] : memref<16x128xf32, #tpu.memory_space<vmem>>, vector<2x128xf32>
    %389 = arith.truncf %386 : vector<2x32xf32> to vector<2x32xbf16>
    %cst_121 = arith.constant dense<0.000000e+00> : vector<2x128xf32>
    %390 = tpu.matmul %389, %265, %cst_121 {dimension_numbers = #tpu.dot_dimension_numbers<[1], [0], [0], [1], [0, 0, 1, 1], [], []>} : vector<2x32xbf16>, vector<32x128xbf16>, vector<2x128xf32> -> vector<2x128xf32>
    %391 = arith.addf %388, %390 : vector<2x128xf32>
    %392 = vector.extract_strided_slice %391 {offsets = [0, 0], sizes = [2, 32], strides = [1, 1]} : vector<2x128xf32> to vector<2x32xf32>
    %393 = arith.negf %392 : vector<2x32xf32>
    %394 = math.exp %393 : vector<2x32xf32>
    %cst_122 = arith.constant 1.000000e+00 : f32
    %395 = vector.broadcast %cst_122 : f32 to vector<2x32xf32>
    %396 = arith.addf %395, %394 : vector<2x32xf32>
    %397 = arith.divf %395, %396 : vector<2x32xf32>
    %398 = vector.extract_strided_slice %391 {offsets = [0, 32], sizes = [2, 32], strides = [1, 1]} : vector<2x128xf32> to vector<2x32xf32>
    %399 = arith.negf %398 : vector<2x32xf32>
    %400 = math.exp %399 : vector<2x32xf32>
    %cst_123 = arith.constant 1.000000e+00 : f32
    %401 = vector.broadcast %cst_123 : f32 to vector<2x32xf32>
    %402 = arith.addf %401, %400 : vector<2x32xf32>
    %403 = arith.divf %401, %402 : vector<2x32xf32>
    %404 = vector.extract_strided_slice %391 {offsets = [0, 64], sizes = [2, 32], strides = [1, 1]} : vector<2x128xf32> to vector<2x32xf32>
    %405 = math.tanh %404 : vector<2x32xf32>
    %406 = vector.extract_strided_slice %391 {offsets = [0, 96], sizes = [2, 32], strides = [1, 1]} : vector<2x128xf32> to vector<2x32xf32>
    %407 = arith.negf %406 : vector<2x32xf32>
    %408 = math.exp %407 : vector<2x32xf32>
    %cst_124 = arith.constant 1.000000e+00 : f32
    %409 = vector.broadcast %cst_124 : f32 to vector<2x32xf32>
    %410 = arith.addf %409, %408 : vector<2x32xf32>
    %411 = arith.divf %409, %410 : vector<2x32xf32>
    %412 = arith.mulf %403, %384 : vector<2x32xf32>
    %413 = arith.mulf %397, %405 : vector<2x32xf32>
    %414 = arith.addf %412, %413 : vector<2x32xf32>
    %415 = math.tanh %414 : vector<2x32xf32>
    %416 = arith.mulf %411, %415 : vector<2x32xf32>
    %c8_125 = arith.constant 8 : index
    %c0_126 = arith.constant 0 : index
    %417 = vector.load %arg7[%c8_125, %c0_126] : memref<16x32xf32, #tpu.memory_space<vmem>>, vector<2x32xf32>
    tpu.vector_store %arg7[%c8_125, %c0_126], %416 {strides = array<i32>} : memref<16x32xf32, #tpu.memory_space<vmem>>, vector<2x32xf32>,
    %c10_127 = arith.constant 10 : index
    %c0_128 = arith.constant 0 : index
    %418 = vector.load %arg12[%c10_127, %c0_128] : memref<16x128xf32, #tpu.memory_space<vmem>>, vector<2x128xf32>
    %419 = arith.truncf %416 : vector<2x32xf32> to vector<2x32xbf16>
    %cst_129 = arith.constant dense<0.000000e+00> : vector<2x128xf32>
    %420 = tpu.matmul %419, %265, %cst_129 {dimension_numbers = #tpu.dot_dimension_numbers<[1], [0], [0], [1], [0, 0, 1, 1], [], []>} : vector<2x32xbf16>, vector<32x128xbf16>, vector<2x128xf32> -> vector<2x128xf32>
    %421 = arith.addf %418, %420 : vector<2x128xf32>
    %422 = vector.extract_strided_slice %421 {offsets = [0, 0], sizes = [2, 32], strides = [1, 1]} : vector<2x128xf32> to vector<2x32xf32>
    %423 = arith.negf %422 : vector<2x32xf32>
    %424 = math.exp %423 : vector<2x32xf32>
    %cst_130 = arith.constant 1.000000e+00 : f32
    %425 = vector.broadcast %cst_130 : f32 to vector<2x32xf32>
    %426 = arith.addf %425, %424 : vector<2x32xf32>
    %427 = arith.divf %425, %426 : vector<2x32xf32>
    %428 = vector.extract_strided_slice %421 {offsets = [0, 32], sizes = [2, 32], strides = [1, 1]} : vector<2x128xf32> to vector<2x32xf32>
    %429 = arith.negf %428 : vector<2x32xf32>
    %430 = math.exp %429 : vector<2x32xf32>
    %cst_131 = arith.constant 1.000000e+00 : f32
    %431 = vector.broadcast %cst_131 : f32 to vector<2x32xf32>
    %432 = arith.addf %431, %430 : vector<2x32xf32>
    %433 = arith.divf %431, %432 : vector<2x32xf32>
    %434 = vector.extract_strided_slice %421 {offsets = [0, 64], sizes = [2, 32], strides = [1, 1]} : vector<2x128xf32> to vector<2x32xf32>
    %435 = math.tanh %434 : vector<2x32xf32>
    %436 = vector.extract_strided_slice %421 {offsets = [0, 96], sizes = [2, 32], strides = [1, 1]} : vector<2x128xf32> to vector<2x32xf32>
    %437 = arith.negf %436 : vector<2x32xf32>
    %438 = math.exp %437 : vector<2x32xf32>
    %cst_132 = arith.constant 1.000000e+00 : f32
    %439 = vector.broadcast %cst_132 : f32 to vector<2x32xf32>
    %440 = arith.addf %439, %438 : vector<2x32xf32>
    %441 = arith.divf %439, %440 : vector<2x32xf32>
    %442 = arith.mulf %433, %414 : vector<2x32xf32>
    %443 = arith.mulf %427, %435 : vector<2x32xf32>
    %444 = arith.addf %442, %443 : vector<2x32xf32>
    %445 = math.tanh %444 : vector<2x32xf32>
    %446 = arith.mulf %441, %445 : vector<2x32xf32>
    %c10_133 = arith.constant 10 : index
    %c0_134 = arith.constant 0 : index
    %447 = vector.load %arg7[%c10_133, %c0_134] : memref<16x32xf32, #tpu.memory_space<vmem>>, vector<2x32xf32>
    tpu.vector_store %arg7[%c10_133, %c0_134], %446 {strides = array<i32>} : memref<16x32xf32, #tpu.memory_space<vmem>>, vector<2x32xf32>,
    %c12_135 = arith.constant 12 : index
    %c0_136 = arith.constant 0 : index
    %448 = vector.load %arg12[%c12_135, %c0_136] : memref<16x128xf32, #tpu.memory_space<vmem>>, vector<2x128xf32>
    %449 = arith.truncf %446 : vector<2x32xf32> to vector<2x32xbf16>
    %cst_137 = arith.constant dense<0.000000e+00> : vector<2x128xf32>
    %450 = tpu.matmul %449, %265, %cst_137 {dimension_numbers = #tpu.dot_dimension_numbers<[1], [0], [0], [1], [0, 0, 1, 1], [], []>} : vector<2x32xbf16>, vector<32x128xbf16>, vector<2x128xf32> -> vector<2x128xf32>
    %451 = arith.addf %448, %450 : vector<2x128xf32>
    %452 = vector.extract_strided_slice %451 {offsets = [0, 0], sizes = [2, 32], strides = [1, 1]} : vector<2x128xf32> to vector<2x32xf32>
    %453 = arith.negf %452 : vector<2x32xf32>
    %454 = math.exp %453 : vector<2x32xf32>
    %cst_138 = arith.constant 1.000000e+00 : f32
    %455 = vector.broadcast %cst_138 : f32 to vector<2x32xf32>
    %456 = arith.addf %455, %454 : vector<2x32xf32>
    %457 = arith.divf %455, %456 : vector<2x32xf32>
    %458 = vector.extract_strided_slice %451 {offsets = [0, 32], sizes = [2, 32], strides = [1, 1]} : vector<2x128xf32> to vector<2x32xf32>
    %459 = arith.negf %458 : vector<2x32xf32>
    %460 = math.exp %459 : vector<2x32xf32>
    %cst_139 = arith.constant 1.000000e+00 : f32
    %461 = vector.broadcast %cst_139 : f32 to vector<2x32xf32>
    %462 = arith.addf %461, %460 : vector<2x32xf32>
    %463 = arith.divf %461, %462 : vector<2x32xf32>
    %464 = vector.extract_strided_slice %451 {offsets = [0, 64], sizes = [2, 32], strides = [1, 1]} : vector<2x128xf32> to vector<2x32xf32>
    %465 = math.tanh %464 : vector<2x32xf32>
    %466 = vector.extract_strided_slice %451 {offsets = [0, 96], sizes = [2, 32], strides = [1, 1]} : vector<2x128xf32> to vector<2x32xf32>
    %467 = arith.negf %466 : vector<2x32xf32>
    %468 = math.exp %467 : vector<2x32xf32>
    %cst_140 = arith.constant 1.000000e+00 : f32
    %469 = vector.broadcast %cst_140 : f32 to vector<2x32xf32>
    %470 = arith.addf %469, %468 : vector<2x32xf32>
    %471 = arith.divf %469, %470 : vector<2x32xf32>
    %472 = arith.mulf %463, %444 : vector<2x32xf32>
    %473 = arith.mulf %457, %465 : vector<2x32xf32>
    %474 = arith.addf %472, %473 : vector<2x32xf32>
    %475 = math.tanh %474 : vector<2x32xf32>
    %476 = arith.mulf %471, %475 : vector<2x32xf32>
    %c12_141 = arith.constant 12 : index
    %c0_142 = arith.constant 0 : index
    %477 = vector.load %arg7[%c12_141, %c0_142] : memref<16x32xf32, #tpu.memory_space<vmem>>, vector<2x32xf32>
    tpu.vector_store %arg7[%c12_141, %c0_142], %476 {strides = array<i32>} : memref<16x32xf32, #tpu.memory_space<vmem>>, vector<2x32xf32>,
    %c14_143 = arith.constant 14 : index
    %c0_144 = arith.constant 0 : index
    %478 = vector.load %arg12[%c14_143, %c0_144] : memref<16x128xf32, #tpu.memory_space<vmem>>, vector<2x128xf32>
    %479 = arith.truncf %476 : vector<2x32xf32> to vector<2x32xbf16>
    %cst_145 = arith.constant dense<0.000000e+00> : vector<2x128xf32>
    %480 = tpu.matmul %479, %265, %cst_145 {dimension_numbers = #tpu.dot_dimension_numbers<[1], [0], [0], [1], [0, 0, 1, 1], [], []>} : vector<2x32xbf16>, vector<32x128xbf16>, vector<2x128xf32> -> vector<2x128xf32>
    %481 = arith.addf %478, %480 : vector<2x128xf32>
    %482 = vector.extract_strided_slice %481 {offsets = [0, 0], sizes = [2, 32], strides = [1, 1]} : vector<2x128xf32> to vector<2x32xf32>
    %483 = arith.negf %482 : vector<2x32xf32>
    %484 = math.exp %483 : vector<2x32xf32>
    %cst_146 = arith.constant 1.000000e+00 : f32
    %485 = vector.broadcast %cst_146 : f32 to vector<2x32xf32>
    %486 = arith.addf %485, %484 : vector<2x32xf32>
    %487 = arith.divf %485, %486 : vector<2x32xf32>
    %488 = vector.extract_strided_slice %481 {offsets = [0, 32], sizes = [2, 32], strides = [1, 1]} : vector<2x128xf32> to vector<2x32xf32>
    %489 = arith.negf %488 : vector<2x32xf32>
    %490 = math.exp %489 : vector<2x32xf32>
    %cst_147 = arith.constant 1.000000e+00 : f32
    %491 = vector.broadcast %cst_147 : f32 to vector<2x32xf32>
    %492 = arith.addf %491, %490 : vector<2x32xf32>
    %493 = arith.divf %491, %492 : vector<2x32xf32>
    %494 = vector.extract_strided_slice %481 {offsets = [0, 64], sizes = [2, 32], strides = [1, 1]} : vector<2x128xf32> to vector<2x32xf32>
    %495 = math.tanh %494 : vector<2x32xf32>
    %496 = vector.extract_strided_slice %481 {offsets = [0, 96], sizes = [2, 32], strides = [1, 1]} : vector<2x128xf32> to vector<2x32xf32>
    %497 = arith.negf %496 : vector<2x32xf32>
    %498 = math.exp %497 : vector<2x32xf32>
    %cst_148 = arith.constant 1.000000e+00 : f32
    %499 = vector.broadcast %cst_148 : f32 to vector<2x32xf32>
    %500 = arith.addf %499, %498 : vector<2x32xf32>
    %501 = arith.divf %499, %500 : vector<2x32xf32>
    %502 = arith.mulf %493, %474 : vector<2x32xf32>
    %503 = arith.mulf %487, %495 : vector<2x32xf32>
    %504 = arith.addf %502, %503 : vector<2x32xf32>
    %505 = math.tanh %504 : vector<2x32xf32>
    %506 = arith.mulf %501, %505 : vector<2x32xf32>
    %c14_149 = arith.constant 14 : index
    %c0_150 = arith.constant 0 : index
    %507 = vector.load %arg7[%c14_149, %c0_150] : memref<16x32xf32, #tpu.memory_space<vmem>>, vector<2x32xf32>
    tpu.vector_store %arg7[%c14_149, %c0_150], %506 {strides = array<i32>} : memref<16x32xf32, #tpu.memory_space<vmem>>, vector<2x32xf32>,
    %c1 = arith.constant 1 : index
    %c0_151 = arith.constant 0 : index
    %c0_152 = arith.constant 0 : index
    %508 = vector.load %arg8[%c1, %c0_151, %c0_152] : memref<2x2x32xf32, #tpu.memory_space<vmem>>, vector<1x2x32xf32>
    %509 = vector.shape_cast %508 : vector<1x2x32xf32> to vector<2x32xf32>
    %510 = vector.shape_cast %506 : vector<2x32xf32> to vector<1x2x32xf32>
    tpu.vector_store %arg8[%c1, %c0_151, %c0_152], %510 {strides = array<i32>} : memref<2x2x32xf32, #tpu.memory_space<vmem>>, vector<1x2x32xf32>,
    %c1_153 = arith.constant 1 : index
    %c0_154 = arith.constant 0 : index
    %c0_155 = arith.constant 0 : index
    %511 = vector.load %arg9[%c1_153, %c0_154, %c0_155] : memref<2x2x32xf32, #tpu.memory_space<vmem>>, vector<1x2x32xf32>
    %512 = vector.shape_cast %511 : vector<1x2x32xf32> to vector<2x32xf32>
    %513 = vector.shape_cast %504 : vector<2x32xf32> to vector<1x2x32xf32>
    tpu.vector_store %arg9[%c1_153, %c0_154, %c0_155], %513 {strides = array<i32>} : memref<2x2x32xf32, #tpu.memory_space<vmem>>, vector<1x2x32xf32>,
    return
  }
}

</mosaic_0001>

<bundles_post_ra>
// kernel: tpu_custom_call.1
= control target key start
LH: loop header
LB: loop body
LE: loop exit
PB: predicated region body
PF: predicated region fallthrough
CT: control target
= control target key end

     0   :  { %15 = vsyncpa [#allocation6], 0  ;;  %s1873_s0 = inlined_call_operand.vmem [shape: f32[16,8], index: 0, kind: input, shape index: {}]   ;;  %s1874_s1 = inlined_call_operand.vmem [shape: bf16[8,128], index: 1, kind: input, shape index: {}]   ;;  %s1875_s2 = inlined_call_operand.vmem [shape: bf16[32,128], index: 2, kind: input, shape index: {}]   ;;  %s1876_s3 = inlined_call_operand.vmem [shape: f32[1,128], index: 3, kind: input, shape index: {}]   ;;  %s1877_s4 = inlined_call_operand.hbm [shape: bf16[32,128], index: 4, kind: input, shape index: {}]   ;;  %s1878_s5 = inlined_call_operand.hbm [shape: bf16[32,128], index: 5, kind: input, shape index: {}]   ;;  %s1879_s6 = inlined_call_operand.vmem [shape: f32[1,128], index: 6, kind: input, shape index: {}]   ;;  %s1880_s7 = inlined_call_operand.hbm [shape: f32[16,32], index: 7, kind: output, shape index: {0}]   ;;  %s1881_s8 = inlined_call_operand.hbm [shape: f32[2,2,32], index: 8, kind: output, shape index: {1}]   ;;  %s1882_s9 = inlined_call_operand.hbm [shape: f32[2,2,32], index: 9, kind: output, shape index: {2}]  }
   0x1   :  { %16 = vsyncpa [#allocation9], 0 }
   0x2   :  { %17 = vsyncpa [#allocation7], 0 }
   0x3   :  { %18 = vsyncpa [#allocation12], 0  ;;  %s31_s11 = sshll.u32 %s1877_s4, 4  ;;  %s1587_s12 = smov [#allocation5]   ;;  %s32_s11 = int_to_ptr.hbm [resolvable:$true] %s31_s11 }
   0x4   :  { %s33_s13 = sshll.u32 %s1587_s12, 4  ;;  %s44_s16 = sshll.u32 %s1878_s5, 4  ;;  %s34_s13 = int_to_ptr.vmem [resolvable:$true] %s33_s13  ;;  %s45_s16 = int_to_ptr.hbm [resolvable:$true] %s44_s16 }
   0x5   :  { %s1588_s17 = smov 64   ;;  %s1589_s18 = smov 4  }
   0x6   :  { %39 = dma.hbm_to_vmem [thread:$0]  %s32_s11, 256, %s34_s13, [#allocation6], %s1588_s17, %s1588_s17, %s1589_s18  }
   0x7   :  { %s1590_s19 = smov [#allocation8]  }
   0x8   :  { %s46_s20 = sshll.u32 %s1590_s19, 4  ;;  %s47_s20 = int_to_ptr.vmem [resolvable:$true] %s46_s20 }
   0x9   :  { %52 = dma.hbm_to_vmem [thread:$0]  %s45_s16, 256, %s47_s20, [#allocation9], %s1588_s17, %s1588_s17, %s1589_s18  }
   0xa   :  { %1579 = dma.done.wait [#allocation6], 256  }
   0xb   :  { %1580 = vsyncadd [#allocation6], 4294967040 }
   0xc   :  { %1581 = dma.done.wait [#allocation9], 256  }
   0xd   :  { %1582 = vsyncadd [#allocation9], 4294967040  ;;  %vm76_vm0 = vcmask 1043456   ;;  %v67_v0 = vld [vmem:[%s1874_s1] sm:$0xf]  ;;  %v1311_v1 = vld [vmem:[%s1875_s2 + $0x8] sm:$0xff] }
   0xe   :  { %v64_v2 = vld [vmem:[%s1873_s0] sm:$0xff]  ;;  %v78_v3 = vsel %vm76_vm0, %v67_v0, 0  ;;  %v65_v4 = vld [vmem:[%s1873_s0 + $0x8] sm:$0xff]  ;;  %123 = vmatpush.bf16.msra.mxu1 %v1311_v1  ;;  %vm72_vm1 = vcmask 64512   ;;  %188 = vmatpush.bf16.msra.mxu2 %v1311_v1  ;;  %v1591_v7 = vmov 0   ;;  %vm113_vm6 = vcmask 261120  }
   0xf   :  { %87 = vmatpush.bf16.msra.mxu0 %v78_v3  ;;  %v66_v5 = vpack.c.bf16 %v65_v4, %v64_v2  ;;  %v1310_v6 = vld [vmem:[%s1875_s2] sm:$0xff]  ;;  %252 = vmatpush.bf16.msra.mxu3 %v1311_v1  ;;  %s1592_s2 = smov 32   ;;  %s1594_s30 = smov [#allocation11]  }
  0x10   :  { %v1329_v8 = vld [vmem:[%s1876_s3] ss:$0 sm:$0xff]  ;;  %s1216_s10 = sshll.u32 %s1594_s30, 4  ;;  %s1595_s11 = smov [#allocation10]   ;;  %s1217_s10 = int_to_ptr.vmem [resolvable:$true] %s1216_s10 }
  0x11   :  { %s1203_s12 = sshll.u32 %s1595_s11, 4  ;;  %s1205_s15 = sshll.u32 %s1880_s7, 4  ;;  %s1204_s12 = int_to_ptr.vmem [resolvable:$true] %s1203_s12  ;;  %s1206_s15 = int_to_ptr.hbm [resolvable:$true] %s1205_s15 }
  0x12   :  { %1254 = vmatmul.msk.bf16.vlgmr.msra.gmra.mxu0 %vm72_vm1, %v66_v5  ;;  %124 = vmatpush.bf16.msra.mxu1 %v1310_v6  ;;  %s1218_s18 = sshll.u32 %s1881_s8, 4  ;;  %s1596_s19 = smov 128   ;;  %s1219_s18 = int_to_ptr.hbm [resolvable:$true] %s1218_s18 }
  0x13   :  { %316 = vmatpush.bf16.msrb.mxu0 %v1311_v1  ;;  %189 = vmatpush.bf16.msra.mxu2 %v1310_v6  ;;  %s1597_s20 = smov 8   ;;  %s1598_s4 = smov 2  }
  0x14   :  { %253 = vmatpush.bf16.msra.mxu3 %v1310_v6  ;;  %s1599_s7 = smov [#allocation13]   ;;  %s1231_s8 = sshll.u32 %s1882_s9, 4  ;;  %s1232_s8 = int_to_ptr.hbm [resolvable:$true] %s1231_s8 }
  0x15   :  { %125 = vmatmul.bf16.vlgmr.msra.gmra.mxu1 %v1591_v7  ;;  %s1229_s21 = sshll.u32 %s1599_s7, 4  ;;  %s1230_s21 = int_to_ptr.vmem [resolvable:$true] %s1229_s21 }
  0x16   :  { %380 = vmatpush.bf16.msrb.mxu1 %v1311_v1 }
  0x17   :  { %317 = vmatpush.bf16.msrb.mxu0 %v1310_v6  ;;  %444 = vmatpush.bf16.msrb.mxu2 %v1311_v1 }
  0x18   :  { %508 = vmatpush.bf16.msrb.mxu3 %v1311_v1 }
  0x1a   :  { %381 = vmatpush.bf16.msrb.mxu1 %v1310_v6 }
  0x1b   :  { %572 = vmatpush.bf16.msra.mxu0 %v1311_v1  ;;  %445 = vmatpush.bf16.msrb.mxu2 %v1310_v6 }
  0x1c   :  { %509 = vmatpush.bf16.msrb.mxu3 %v1310_v6 }
  0x1f   :  { %573 = vmatpush.bf16.msra.mxu0 %v1310_v6 }
  0x8f   :  { %v89_v9 = vpop.f32.mrf.mxu0 }
  0x90   :  { %v90_v10 = vadd.f32 %v1329_v8, %v89_v9 }
  0x92   :  { %94 = vst [vmem:[#allocation4] sm:$0xff] %v90_v10  ;;  %v126_v11 = vpop.f32.mrf.mxu1 }
  0x97   :  { %v91_v12 = vpop.f32.mrf.mxu0 }
  0x98   :  { %v92_v13 = vadd.f32 %v1329_v8, %v91_v12 }
  0x99   :  { %v100_v14 = vld [vmem:[#allocation4] sm:$0x3]  ;;  %v174_v41 = vld [vmem:[#allocation4 + $0x2] sm:$0x3]  ;;  %v238_v5 = vld [vmem:[#allocation4 + $0x4] sm:$0x3] }
  0x9a   :  { %v130_v15 = vadd.f32 %v126_v11, %v100_v14  ;;  %95 = vst [vmem:[#allocation4 + $0x8] sm:$0xff] %v92_v13  ;;  %v128_v16 = vpop.f32.mrf.mxu1 }
  0x9c   :  { %1331 = vtanh.f32 %v130_v15  ;;  %v1263_v18 = vmul.f32 -1.442695, %v130_v15 }
  0x9e   :  { %1333 = vpow2.f32 %v1263_v18 }
  0xa2   :  { %v1332_v17 = vpop.eup %1331 }
  0xa3   :  { %153 = vrot.lane.b32.xlu0 %v1332_v17, %s1588_s17 }
  0xa4   :  { %v1334_v19 = vpop.eup %1333 }
  0xa5   :  { %v134_v20 = vadd.f32 1.0, %v1334_v19 }
  0xa7   :  { %1335 = vrcp.f32 %v134_v20  ;;  %v146_v26 = vand.u32 2147483648, %v134_v20  ;;  %vm140_vm3 = vweird.f32 %v134_v20  ;;  %v144_v27 = vand.u32 2147483647, %v134_v20 }
  0xa9   :  { %v147_v29 = vor.u32 1.1754944e-38, %v146_v26  ;;  %vm145_vm5 = vcmp.eq.f32.partialorder %v144_v27, 8.507059e+37 }
  0xad   :  { %v1336_v21 = vpop.eup %1335 }
  0xae   :  { %v136_v22 = vmul.f32 %v1336_v21, %v134_v20  ;;  %vm141_vm2 = vweird.f32 %v1336_v21 }
  0xaf   :  { %vm142_vm4 = vmor %vm140_vm3, %vm141_vm2 }
  0xb0   :  { %v137_v23 = vsub.f32 1.0, %v136_v22 }
  0xb2   :  { %v138_v24 = vmul.f32 %v1336_v21, %v137_v23 }
  0xb4   :  { %v139_v25 = vadd.f32 %v1336_v21, %v138_v24 }
  0xb6   :  { %v143_v28 = vsel %vm142_vm4, %v1336_v21, %v139_v25 }
  0xb7   :  { %v148_v31 = vsel %vm145_vm5, %v147_v29, %v143_v28 }
  0xb8   :  { %v151_v33 = vmul.f32 0.0, %v148_v31 }
 0x115   :  { %v154_v30 = vpop.permute.xlu0 %153 }
 0x116   :  { %v156_v32 = vmul.f32 %v154_v30, %v148_v31 }
 0x118   :  { %158 = vrot.lane.b32.xlu0 %v156_v32, %s1592_s2 }
 0x18a   :  { %v159_v34 = vpop.permute.xlu0 %158 }
 0x18b   :  { %v161_v35 = vadd.f32 %v159_v34, %v151_v33  ;;  %v302_v34 = vld [vmem:[#allocation4 + $0x6] sm:$0x3] }
 0x18d   :  { %1337 = vtanh.f32 %v161_v35 }
 0x193   :  { %v1338_v36 = vpop.eup %1337 }
 0x194   :  { %164 = vrot.lane.b32.xlu1 %v1338_v36, %s1588_s17 }
 0x206   :  { %v165_v37 = vpop.permute.xlu1 %164 }
 0x207   :  { %v1682_v38 = vmul.f32 %v165_v37, %v148_v31 }
 0x209   :  { %v175_v39 = vpack.c.bf16 %v1682_v38, %v1682_v38 }
 0x20b   :  { %177 = vrot.lane.b32.xlu1 %v175_v39, %s1592_s2 }
 0x27d   :  { %v178_v40 = vpop.permute.xlu1 %177 }
 0x27e   :  { %1264 = vmatmul.msk.bf16.vlgmr.msra.gmra.mxu2 %vm113_vm6, %v178_v40 }
 0x301   :  { %v191_v42 = vpop.f32.mrf.mxu2 }
 0x302   :  { %v195_v43 = vadd.f32 %v191_v42, %v174_v41 }
 0x304   :  { %1339 = vtanh.f32 %v195_v43  ;;  %v1265_v46 = vmul.f32 -1.442695, %v195_v43 }
 0x306   :  { %1341 = vpow2.f32 %v1265_v46 }
 0x309   :  { %v193_v44 = vpop.f32.mrf.mxu2 }
 0x30a   :  { %v1340_v45 = vpop.eup %1339 }
 0x30b   :  { %218 = vrot.lane.b32.xlu2 %v1340_v45, %s1588_s17 }
 0x30c   :  { %v1342_v47 = vpop.eup %1341 }
 0x30d   :  { %v199_v48 = vadd.f32 1.0, %v1342_v47 }
 0x30f   :  { %1343 = vrcp.f32 %v199_v48  ;;  %v211_v54 = vand.u32 2147483648, %v199_v48  ;;  %vm205_vm8 = vweird.f32 %v199_v48  ;;  %v209_v55 = vand.u32 2147483647, %v199_v48 }
 0x311   :  { %v212_v57 = vor.u32 1.1754944e-38, %v211_v54  ;;  %vm210_vm10 = vcmp.eq.f32.partialorder %v209_v55, 8.507059e+37 }
 0x315   :  { %v1344_v49 = vpop.eup %1343 }
 0x316   :  { %v201_v50 = vmul.f32 %v1344_v49, %v199_v48  ;;  %vm206_vm7 = vweird.f32 %v1344_v49 }
 0x317   :  { %vm207_vm9 = vmor %vm205_vm8, %vm206_vm7 }
 0x318   :  { %v202_v51 = vsub.f32 1.0, %v201_v50 }
 0x31a   :  { %v203_v52 = vmul.f32 %v1344_v49, %v202_v51 }
 0x31c   :  { %v204_v53 = vadd.f32 %v1344_v49, %v203_v52 }
 0x31e   :  { %v208_v56 = vsel %vm207_vm9, %v1344_v49, %v204_v53 }
 0x31f   :  { %v213_v59 = vsel %vm210_vm10, %v212_v57, %v208_v56 }
 0x320   :  { %v216_v61 = vmul.f32 %v213_v59, %v161_v35 }
 0x365   :  { %v219_v58 = vpop.permute.xlu2 %218 }
 0x366   :  { %v221_v60 = vmul.f32 %v219_v58, %v213_v59 }
 0x368   :  { %223 = vrot.lane.b32.xlu2 %v221_v60, %s1592_s2 }
 0x3c2   :  { %v224_v62 = vpop.permute.xlu2 %223 }
 0x3c3   :  { %v226_v63 = vadd.f32 %v224_v62, %v216_v61 }
 0x3c5   :  { %1345 = vtanh.f32 %v226_v63 }
 0x3cb   :  { %v1346_v0 = vpop.eup %1345 }
 0x3cc   :  { %229 = vrot.lane.b32.xlu0 %v1346_v0, %s1588_s17 }
 0x43e   :  { %v230_v1 = vpop.permute.xlu0 %229 }
 0x43f   :  { %v1691_v2 = vmul.f32 %v230_v1, %v213_v59 }
 0x441   :  { %v239_v3 = vpack.c.bf16 %v1691_v2, %v1691_v2 }
 0x443   :  { %241 = vrot.lane.b32.xlu1 %v239_v3, %s1592_s2 }
 0x4b5   :  { %v242_v4 = vpop.permute.xlu1 %241 }
 0x4b6   :  { %1266 = vmatmul.msk.bf16.vlgmr.msra.gmra.mxu3 %vm113_vm6, %v242_v4 }
 0x539   :  { %v255_v6 = vpop.f32.mrf.mxu3 }
 0x53a   :  { %v259_v8 = vadd.f32 %v255_v6, %v238_v5 }
 0x53c   :  { %1347 = vtanh.f32 %v259_v8  ;;  %v1267_v11 = vmul.f32 -1.442695, %v259_v8 }
 0x53e   :  { %1349 = vpow2.f32 %v1267_v11 }
 0x541   :  { %v257_v9 = vpop.f32.mrf.mxu3 }
 0x542   :  { %v1348_v10 = vpop.eup %1347 }
 0x543   :  { %282 = vrot.lane.b32.xlu2 %v1348_v10, %s1588_s17 }
 0x544   :  { %v1350_v12 = vpop.eup %1349 }
 0x545   :  { %v263_v13 = vadd.f32 1.0, %v1350_v12 }
 0x547   :  { %1351 = vrcp.f32 %v263_v13  ;;  %v275_v19 = vand.u32 2147483648, %v263_v13  ;;  %vm269_vm12 = vweird.f32 %v263_v13  ;;  %v273_v20 = vand.u32 2147483647, %v263_v13 }
 0x549   :  { %v276_v22 = vor.u32 1.1754944e-38, %v275_v19  ;;  %vm274_vm14 = vcmp.eq.f32.partialorder %v273_v20, 8.507059e+37 }
 0x54d   :  { %v1352_v14 = vpop.eup %1351 }
 0x54e   :  { %v265_v15 = vmul.f32 %v1352_v14, %v263_v13  ;;  %vm270_vm11 = vweird.f32 %v1352_v14 }
 0x54f   :  { %vm271_vm13 = vmor %vm269_vm12, %vm270_vm11 }
 0x550   :  { %v266_v16 = vsub.f32 1.0, %v265_v15 }
 0x552   :  { %v267_v17 = vmul.f32 %v1352_v14, %v266_v16 }
 0x554   :  { %v268_v18 = vadd.f32 %v1352_v14, %v267_v17 }
 0x556   :  { %v272_v21 = vsel %vm271_vm13, %v1352_v14, %v268_v18 }
 0x557   :  { %v277_v24 = vsel %vm274_vm14, %v276_v22, %v272_v21 }
 0x558   :  { %v280_v26 = vmul.f32 %v277_v24, %v226_v63  ;;  %v366_v63 = vld [vmem:[#allocation4 + $0x8] sm:$0x3] }
 0x59d   :  { %v283_v23 = vpop.permute.xlu2 %282 }
 0x59e   :  { %v285_v25 = vmul.f32 %v283_v23, %v277_v24 }
 0x5a0   :  { %287 = vrot.lane.b32.xlu0 %v285_v25, %s1592_s2 }
 0x612   :  { %v288_v27 = vpop.permute.xlu0 %287 }
 0x613   :  { %v290_v28 = vadd.f32 %v288_v27, %v280_v26 }
 0x615   :  { %1353 = vtanh.f32 %v290_v28 }
 0x61b   :  { %v1354_v29 = vpop.eup %1353 }
 0x61c   :  { %293 = vrot.lane.b32.xlu1 %v1354_v29, %s1588_s17  ;;  %v430_v29 = vld [vmem:[#allocation4 + $0xa] sm:$0x3] }
 0x68e   :  { %v294_v30 = vpop.permute.xlu1 %293 }
 0x68f   :  { %v1700_v31 = vmul.f32 %v294_v30, %v277_v24 }
 0x691   :  { %v303_v32 = vpack.c.bf16 %v1700_v31, %v1700_v31 }
 0x693   :  { %305 = vrot.lane.b32.xlu2 %v303_v32, %s1592_s2 }
 0x6ed   :  { %v306_v33 = vpop.permute.xlu2 %305 }
 0x6ee   :  { %1268 = vmatmul.msk.bf16.vlgmr.msrb.gmra.mxu0 %vm113_vm6, %v306_v33 }
 0x76b   :  { %v319_v35 = vpop.f32.mrf.mxu0 }
 0x76c   :  { %v323_v36 = vadd.f32 %v319_v35, %v302_v34 }
 0x76e   :  { %1355 = vtanh.f32 %v323_v36  ;;  %v1269_v40 = vmul.f32 -1.442695, %v323_v36 }
 0x770   :  { %1357 = vpow2.f32 %v1269_v40 }
 0x773   :  { %v321_v37 = vpop.f32.mrf.mxu0 }
 0x774   :  { %v1356_v39 = vpop.eup %1355 }
 0x775   :  { %346 = vrot.lane.b32.xlu0 %v1356_v39, %s1588_s17 }
 0x776   :  { %v1358_v41 = vpop.eup %1357 }
 0x777   :  { %v327_v42 = vadd.f32 1.0, %v1358_v41 }
 0x779   :  { %1359 = vrcp.f32 %v327_v42  ;;  %v339_v48 = vand.u32 2147483648, %v327_v42  ;;  %vm333_vm0 = vweird.f32 %v327_v42  ;;  %v337_v49 = vand.u32 2147483647, %v327_v42 }
 0x77b   :  { %v340_v51 = vor.u32 1.1754944e-38, %v339_v48  ;;  %vm338_vm2 = vcmp.eq.f32.partialorder %v337_v49, 8.507059e+37 }
 0x77f   :  { %v1360_v43 = vpop.eup %1359 }
 0x780   :  { %v329_v44 = vmul.f32 %v1360_v43, %v327_v42  ;;  %vm334_vm15 = vweird.f32 %v1360_v43 }
 0x781   :  { %vm335_vm1 = vmor %vm333_vm0, %vm334_vm15 }
 0x782   :  { %v330_v45 = vsub.f32 1.0, %v329_v44 }
 0x784   :  { %v331_v46 = vmul.f32 %v1360_v43, %v330_v45 }
 0x786   :  { %v332_v47 = vadd.f32 %v1360_v43, %v331_v46 }
 0x788   :  { %v336_v50 = vsel %vm335_vm1, %v1360_v43, %v332_v47 }
 0x789   :  { %v341_v53 = vsel %vm338_vm2, %v340_v51, %v336_v50 }
 0x78a   :  { %v344_v55 = vmul.f32 %v341_v53, %v290_v28 }
 0x7e7   :  { %v347_v52 = vpop.permute.xlu0 %346 }
 0x7e8   :  { %v349_v54 = vmul.f32 %v347_v52, %v341_v53 }
 0x7ea   :  { %351 = vrot.lane.b32.xlu1 %v349_v54, %s1592_s2 }
 0x85c   :  { %v352_v56 = vpop.permute.xlu1 %351 }
 0x85d   :  { %v354_v57 = vadd.f32 %v352_v56, %v344_v55 }
 0x85f   :  { %1361 = vtanh.f32 %v354_v57 }
 0x865   :  { %v1362_v58 = vpop.eup %1361 }
 0x866   :  { %357 = vrot.lane.b32.xlu2 %v1362_v58, %s1588_s17 }
 0x8c0   :  { %v358_v59 = vpop.permute.xlu2 %357 }
 0x8c1   :  { %v1709_v60 = vmul.f32 %v358_v59, %v341_v53  ;;  %v494_v59 = vld [vmem:[#allocation4 + $0xc] sm:$0x3] }
 0x8c3   :  { %v367_v61 = vpack.c.bf16 %v1709_v60, %v1709_v60 }
 0x8c5   :  { %369 = vrot.lane.b32.xlu0 %v367_v61, %s1592_s2 }
 0x937   :  { %v370_v62 = vpop.permute.xlu0 %369 }
 0x938   :  { %1270 = vmatmul.msk.bf16.vlgmr.msrb.gmra.mxu1 %vm113_vm6, %v370_v62 }
 0x9b5   :  { %v383_v0 = vpop.f32.mrf.mxu1 }
 0x9b6   :  { %v387_v1 = vadd.f32 %v383_v0, %v366_v63 }
 0x9b8   :  { %1363 = vtanh.f32 %v387_v1  ;;  %v1271_v5 = vmul.f32 -1.442695, %v387_v1 }
 0x9ba   :  { %1365 = vpow2.f32 %v1271_v5 }
 0x9bd   :  { %v385_v3 = vpop.f32.mrf.mxu1 }
 0x9be   :  { %v1364_v4 = vpop.eup %1363 }
 0x9bf   :  { %410 = vrot.lane.b32.xlu1 %v1364_v4, %s1588_s17 }
 0x9c0   :  { %v1366_v6 = vpop.eup %1365 }
 0x9c1   :  { %v391_v8 = vadd.f32 1.0, %v1366_v6 }
 0x9c3   :  { %1367 = vrcp.f32 %v391_v8  ;;  %v403_v14 = vand.u32 2147483648, %v391_v8  ;;  %vm397_vm4 = vweird.f32 %v391_v8  ;;  %v401_v15 = vand.u32 2147483647, %v391_v8 }
 0x9c5   :  { %v404_v17 = vor.u32 1.1754944e-38, %v403_v14  ;;  %vm402_vm7 = vcmp.eq.f32.partialorder %v401_v15, 8.507059e+37 }
 0x9c9   :  { %v1368_v9 = vpop.eup %1367 }
 0x9ca   :  { %v393_v10 = vmul.f32 %v1368_v9, %v391_v8  ;;  %vm398_vm3 = vweird.f32 %v1368_v9 }
 0x9cb   :  { %vm399_vm5 = vmor %vm397_vm4, %vm398_vm3  ;;  %vm172_vm4 = vcmask 254976  }
 0x9cc   :  { %v394_v11 = vsub.f32 1.0, %v393_v10 }
 0x9ce   :  { %v395_v12 = vmul.f32 %v1368_v9, %v394_v11 }
 0x9d0   :  { %v396_v13 = vadd.f32 %v1368_v9, %v395_v12 }
 0x9d2   :  { %v400_v16 = vsel %vm399_vm5, %v1368_v9, %v396_v13 }
 0x9d3   :  { %v405_v19 = vsel %vm402_vm7, %v404_v17, %v400_v16 }
 0x9d4   :  { %v408_v21 = vmul.f32 %v405_v19, %v354_v57 }
 0xa31   :  { %v411_v18 = vpop.permute.xlu1 %410 }
 0xa32   :  { %v413_v20 = vmul.f32 %v411_v18, %v405_v19 }
 0xa34   :  { %415 = vrot.lane.b32.xlu2 %v413_v20, %s1592_s2 }
 0xa8e   :  { %v416_v22 = vpop.permute.xlu2 %415 }
 0xa8f   :  { %v418_v23 = vadd.f32 %v416_v22, %v408_v21 }
 0xa91   :  { %1369 = vtanh.f32 %v418_v23 }
 0xa97   :  { %v1370_v24 = vpop.eup %1369 }
 0xa98   :  { %421 = vrot.lane.b32.xlu0 %v1370_v24, %s1588_s17 }
 0xb0a   :  { %v422_v25 = vpop.permute.xlu0 %421 }
 0xb0b   :  { %v1718_v26 = vmul.f32 %v422_v25, %v405_v19 }
 0xb0d   :  { %v431_v27 = vpack.c.bf16 %v1718_v26, %v1718_v26 }
 0xb0f   :  { %433 = vrot.lane.b32.xlu1 %v431_v27, %s1592_s2  ;;  %v558_v27 = vld [vmem:[#allocation4 + $0xe] sm:$0x3] }
 0xb81   :  { %v434_v28 = vpop.permute.xlu1 %433 }
 0xb82   :  { %1272 = vmatmul.msk.bf16.vlgmr.msrb.gmra.mxu2 %vm113_vm6, %v434_v28 }
 0xc05   :  { %v447_v30 = vpop.f32.mrf.mxu2 }
 0xc06   :  { %v451_v32 = vadd.f32 %v447_v30, %v430_v29 }
 0xc08   :  { %1371 = vtanh.f32 %v451_v32  ;;  %v1273_v35 = vmul.f32 -1.442695, %v451_v32 }
 0xc0a   :  { %1373 = vpow2.f32 %v1273_v35 }
 0xc0d   :  { %v449_v33 = vpop.f32.mrf.mxu2 }
 0xc0e   :  { %v1372_v34 = vpop.eup %1371 }
 0xc0f   :  { %474 = vrot.lane.b32.xlu2 %v1372_v34, %s1588_s17 }
 0xc10   :  { %v1374_v36 = vpop.eup %1373 }
 0xc11   :  { %v455_v37 = vadd.f32 1.0, %v1374_v36 }
 0xc13   :  { %1375 = vrcp.f32 %v455_v37  ;;  %v467_v44 = vand.u32 2147483648, %v455_v37  ;;  %vm461_vm9 = vweird.f32 %v455_v37  ;;  %v465_v45 = vand.u32 2147483647, %v455_v37 }
 0xc15   :  { %v468_v47 = vor.u32 1.1754944e-38, %v467_v44  ;;  %vm466_vm11 = vcmp.eq.f32.partialorder %v465_v45, 8.507059e+37 }
 0xc19   :  { %v1376_v39 = vpop.eup %1375 }
 0xc1a   :  { %v457_v40 = vmul.f32 %v1376_v39, %v455_v37  ;;  %vm462_vm8 = vweird.f32 %v1376_v39 }
 0xc1b   :  { %vm463_vm10 = vmor %vm461_vm9, %vm462_vm8 }
 0xc1c   :  { %v458_v41 = vsub.f32 1.0, %v457_v40 }
 0xc1e   :  { %v459_v42 = vmul.f32 %v1376_v39, %v458_v41 }
 0xc20   :  { %v460_v43 = vadd.f32 %v1376_v39, %v459_v42 }
 0xc22   :  { %v464_v46 = vsel %vm463_vm10, %v1376_v39, %v460_v43 }
 0xc23   :  { %v469_v49 = vsel %vm466_vm11, %v468_v47, %v464_v46 }
 0xc24   :  { %v472_v51 = vmul.f32 %v469_v49, %v418_v23 }
 0xc69   :  { %v475_v48 = vpop.permute.xlu2 %474 }
 0xc6a   :  { %v477_v50 = vmul.f32 %v475_v48, %v469_v49 }
 0xc6c   :  { %479 = vrot.lane.b32.xlu0 %v477_v50, %s1592_s2 }
 0xcde   :  { %v480_v52 = vpop.permute.xlu0 %479 }
 0xcdf   :  { %v482_v53 = vadd.f32 %v480_v52, %v472_v51 }
 0xce1   :  { %1377 = vtanh.f32 %v482_v53 }
 0xce7   :  { %v1378_v54 = vpop.eup %1377 }
 0xce8   :  { %485 = vrot.lane.b32.xlu1 %v1378_v54, %s1588_s17 }
 0xd5a   :  { %v486_v55 = vpop.permute.xlu1 %485 }
 0xd5b   :  { %v1727_v56 = vmul.f32 %v486_v55, %v469_v49  ;;  %v1315_v55 = vld [vmem:[#allocation8 + $0x8] sm:$0xff] }
 0xd5c   :  { %693 = vmatpush.bf16.msra.mxu2 %v1315_v55  ;;  %757 = vmatpush.bf16.msra.mxu3 %v1315_v55 }
 0xd5d   :  { %v495_v57 = vpack.c.bf16 %v1727_v56, %v1727_v56  ;;  %821 = vmatpush.bf16.msrb.mxu0 %v1315_v55 }
 0xd5f   :  { %497 = vrot.lane.b32.xlu2 %v495_v57, %s1592_s2 }
 0xdb9   :  { %v498_v58 = vpop.permute.xlu2 %497 }
 0xdba   :  { %1274 = vmatmul.msk.bf16.vlgmr.msrb.gmra.mxu3 %vm113_vm6, %v498_v58 }
 0xe3d   :  { %v511_v61 = vpop.f32.mrf.mxu3 }
 0xe3e   :  { %v515_v62 = vadd.f32 %v511_v61, %v494_v59 }
 0xe40   :  { %1379 = vtanh.f32 %v515_v62  ;;  %v1275_v1 = vmul.f32 -1.442695, %v515_v62  ;;  %v1314_v62 = vld [vmem:[#allocation8] sm:$0xff] }
 0xe41   :  { %694 = vmatpush.bf16.msra.mxu2 %v1314_v62  ;;  %758 = vmatpush.bf16.msra.mxu3 %v1314_v62 }
 0xe42   :  { %1381 = vpow2.f32 %v1275_v1  ;;  %822 = vmatpush.bf16.msrb.mxu0 %v1314_v62 }
 0xe44   :  { %695 = vmatmul.bf16.vlgmr.msra.gmra.mxu2 %v1591_v7 }
 0xe45   :  { %v513_v63 = vpop.f32.mrf.mxu3  ;;  %949 = vmatpush.bf16.msrb.mxu2 %v1315_v55  ;;  %1013 = vmatpush.bf16.msrb.mxu3 %v1315_v55 }
 0xe46   :  { %v1380_v0 = vpop.eup %1379 }
 0xe47   :  { %538 = vrot.lane.b32.xlu0 %v1380_v0, %s1588_s17 }
 0xe48   :  { %v1382_v3 = vpop.eup %1381 }
 0xe49   :  { %v519_v4 = vadd.f32 1.0, %v1382_v3  ;;  %950 = vmatpush.bf16.msrb.mxu2 %v1314_v62  ;;  %1014 = vmatpush.bf16.msrb.mxu3 %v1314_v62 }
 0xe4b   :  { %1383 = vrcp.f32 %v519_v4  ;;  %v531_v11 = vand.u32 2147483648, %v519_v4  ;;  %vm525_vm13 = vweird.f32 %v519_v4  ;;  %v529_v12 = vand.u32 2147483647, %v519_v4 }
 0xe4d   :  { %v532_v14 = vor.u32 1.1754944e-38, %v531_v11  ;;  %vm530_vm15 = vcmp.eq.f32.partialorder %v529_v12, 8.507059e+37 }
 0xe51   :  { %v1384_v5 = vpop.eup %1383 }
 0xe52   :  { %v521_v6 = vmul.f32 %v1384_v5, %v519_v4  ;;  %vm526_vm12 = vweird.f32 %v1384_v5  ;;  %v1330_v4 = vld [vmem:[%s1879_s6] ss:$0 sm:$0xff]  ;;  %s1593_s6 = smov 96  }
 0xe53   :  { %vm527_vm14 = vmor %vm525_vm13, %vm526_vm12 }
 0xe54   :  { %v522_v8 = vsub.f32 1.0, %v521_v6 }
 0xe56   :  { %v523_v9 = vmul.f32 %v1384_v5, %v522_v8 }
 0xe58   :  { %v524_v10 = vadd.f32 %v1384_v5, %v523_v9 }
 0xe5a   :  { %v528_v13 = vsel %vm527_vm14, %v1384_v5, %v524_v10 }
 0xe5b   :  { %v533_v16 = vsel %vm530_vm15, %v532_v14, %v528_v13 }
 0xe5c   :  { %v536_v18 = vmul.f32 %v533_v16, %v482_v53 }
 0xeb9   :  { %v539_v15 = vpop.permute.xlu0 %538 }
 0xeba   :  { %v541_v17 = vmul.f32 %v539_v15, %v533_v16 }
 0xebc   :  { %543 = vrot.lane.b32.xlu1 %v541_v17, %s1592_s2 }
 0xec7   :  { %v696_v3 = vpop.f32.mrf.mxu2 }
 0xecf   :  { %v698_v7 = vpop.f32.mrf.mxu2 }
 0xf2e   :  { %v544_v19 = vpop.permute.xlu1 %543 }
 0xf2f   :  { %v546_v20 = vadd.f32 %v544_v19, %v536_v18 }
 0xf31   :  { %1385 = vtanh.f32 %v546_v20 }
 0xf37   :  { %v1386_v21 = vpop.eup %1385 }
 0xf38   :  { %549 = vrot.lane.b32.xlu2 %v1386_v21, %s1588_s17 }
 0xf92   :  { %v550_v22 = vpop.permute.xlu2 %549 }
 0xf93   :  { %v552_v23 = vmul.f32 %v550_v22, %v533_v16 }
 0xf95   :  { %v559_v24 = vpack.c.bf16 %v552_v23, %v552_v23 }
 0xf97   :  { %561 = vrot.lane.b32.xlu0 %v559_v24, %s1592_s2 }
0x1009   :  { %v562_v25 = vpop.permute.xlu0 %561 }
0x100a   :  { %1276 = vmatmul.msk.bf16.vlgmr.msra.gmra.mxu0 %vm113_vm6, %v562_v25 }
0x100b   :  { %1077 = vmatpush.bf16.msra.mxu0 %v1315_v55 }
0x100f   :  { %1078 = vmatpush.bf16.msra.mxu0 %v1314_v62 }
0x1087   :  { %v575_v28 = vpop.f32.mrf.mxu0 }
0x1088   :  { %v579_v29 = vadd.f32 %v575_v28, %v558_v27 }
0x108a   :  { %1387 = vtanh.f32 %v579_v29  ;;  %v1277_v33 = vmul.f32 -1.442695, %v579_v29 }
0x108c   :  { %1389 = vpow2.f32 %v1277_v33 }
0x108f   :  { %v577_v30 = vpop.f32.mrf.mxu0 }
0x1090   :  { %v1388_v32 = vpop.eup %1387 }
0x1091   :  { %602 = vrot.lane.b32.xlu1 %v1388_v32, %s1588_s17 }
0x1092   :  { %v1390_v34 = vpop.eup %1389 }
0x1093   :  { %v583_v35 = vadd.f32 1.0, %v1390_v34 }
0x1095   :  { %1391 = vrcp.f32 %v583_v35  ;;  %v595_v42 = vand.u32 2147483648, %v583_v35  ;;  %vm589_vm1 = vweird.f32 %v583_v35  ;;  %v593_v43 = vand.u32 2147483647, %v583_v35 }
0x1097   :  { %v596_v44 = vor.u32 1.1754944e-38, %v595_v42  ;;  %vm594_vm3 = vcmp.eq.f32.partialorder %v593_v43, 8.507059e+37 }
0x1099   :  { %169 = vrot.lane.b32.xlu1 %v1682_v38, %s1592_s2 }
0x109b   :  { %v1392_v36 = vpop.eup %1391 }
0x109c   :  { %v585_v37 = vmul.f32 %v1392_v36, %v583_v35  ;;  %vm590_vm0 = vweird.f32 %v1392_v36 }
0x109d   :  { %vm591_vm2 = vmor %vm589_vm1, %vm590_vm0 }
0x109e   :  { %v586_v39 = vsub.f32 1.0, %v585_v37 }
0x10a0   :  { %v587_v40 = vmul.f32 %v1392_v36, %v586_v39 }
0x10a1   :  { %362 = vrot.lane.b32.xlu1 %v1709_v60, %s1592_s2 }
0x10a2   :  { %v588_v41 = vadd.f32 %v1392_v36, %v587_v40 }
0x10a4   :  { %v592_v38 = vsel %vm591_vm2, %v1392_v36, %v588_v41 }
0x10a5   :  { %v597_v45 = vsel %vm594_vm3, %v596_v44, %v592_v38 }
0x10a6   :  { %v600_v50 = vmul.f32 %v597_v45, %v546_v20 }
0x10a9   :  { %554 = vrot.lane.b32.xlu1 %v552_v23, %s1592_s2 }
0x1103   :  { %v603_v60 = vpop.permute.xlu1 %602 }
0x1104   :  { %v605_v46 = vmul.f32 %v603_v60, %v597_v45 }
0x1106   :  { %607 = vrot.lane.b32.xlu2 %v605_v46, %s1592_s2 }
0x110b   :  { %v170_v47 = vpop.permute.xlu1 %169 }
0x110c   :  { %173 = vst.msk [vmem:[#allocation2] sm:$0x3] %vm172_vm4, %v170_v47 }
0x110e   :  { %234 = vrot.lane.b32.xlu2 %v1691_v2, %s1592_s2 }
0x1113   :  { %v363_v48 = vpop.permute.xlu1 %362 }
0x1114   :  { %365 = vst.msk [vmem:[#allocation2 + $0x6] sm:$0x3] %vm172_vm4, %v363_v48 }
0x1116   :  { %426 = vrot.lane.b32.xlu2 %v1718_v26, %s1592_s2  ;;  %v1313_v26 = vld [vmem:[#allocation5 + $0x8] sm:$0xff] }
0x1117   :  { %660 = vmatpush.bf16.msra.mxu1 %v1313_v26 }
0x111b   :  { %v555_v49 = vpop.permute.xlu1 %554 }
0x111c   :  { %557 = vst.msk [vmem:[#allocation2 + $0xc] sm:$0x3] %vm172_vm4, %v555_v49 }
0x1160   :  { %v608_v51 = vpop.permute.xlu2 %607 }
0x1161   :  { %v1752_v52 = vadd.f32 %v608_v51, %v600_v50 }
0x1163   :  { %1393 = vtanh.f32 %v1752_v52 }
0x1168   :  { %v235_v53 = vpop.permute.xlu2 %234 }
0x1169   :  { %v1394_v54 = vpop.eup %1393  ;;  %237 = vst.msk [vmem:[#allocation2 + $0x2] sm:$0x3] %vm172_vm4, %v235_v53 }
0x116a   :  { %613 = vrot.lane.b32.xlu0 %v1394_v54, %s1588_s17 }
0x1170   :  { %v427_v2 = vpop.permute.xlu2 %426 }
0x1171   :  { %429 = vst.msk [vmem:[#allocation2 + $0x8] sm:$0x3] %vm172_vm4, %v427_v2 }
0x1172   :  { %298 = vrot.lane.b32.xlu0 %v1700_v31, %s1592_s2  ;;  %v1312_v31 = vld [vmem:[#allocation5] sm:$0xff] }
0x1173   :  { %661 = vmatpush.bf16.msra.mxu1 %v1312_v31 }
0x1177   :  { %885 = vmatpush.bf16.msrb.mxu1 %v1315_v55 }
0x117a   :  { %490 = vrot.lane.b32.xlu0 %v1727_v56, %s1592_s2 }
0x117b   :  { %886 = vmatpush.bf16.msrb.mxu1 %v1314_v62 }
0x11dc   :  { %v614_v57 = vpop.permute.xlu0 %613 }
0x11dd   :  { %v616_v58 = vmul.f32 %v614_v57, %v597_v45 }
0x11df   :  { %618 = vrot.lane.b32.xlu2 %v616_v58, %s1592_s2 }
0x11e4   :  { %v299_v59 = vpop.permute.xlu0 %298 }
0x11e5   :  { %301 = vst.msk [vmem:[#allocation2 + $0x4] sm:$0x3] %vm172_vm4, %v299_v59 }
0x11ec   :  { %v491_v61 = vpop.permute.xlu0 %490  ;;  %v628_v63 = vld [vmem:[#allocation2] sm:$0xff] }
0x11ed   :  { %493 = vst.msk [vmem:[#allocation2 + $0xa] sm:$0x3] %vm172_vm4, %v491_v61 }
0x1239   :  { %v619_v56 = vpop.permute.xlu2 %618 }
0x123a   :  { %621 = vst.msk [vmem:[#allocation2 + $0xe] sm:$0x3] %vm172_vm4, %v619_v56 }
0x123b   :  { %622 = vst.msk [vmem:[#allocation11] sm:$0x3] %vm172_vm4, %v619_v56 }
0x1241   :  { %v629_v0 = vld [vmem:[#allocation2 + $0x8] sm:$0xff] }
0x1242   :  { %v630_v1 = vpack.c.bf16 %v629_v0, %v628_v63 }
0x1244   :  { %1286 = vmatmul.msk.bf16.vlgmr.msra.gmra.mxu1 %vm113_vm6, %v630_v1 }
0x1245   :  { %1141 = vmatpush.bf16.msra.mxu1 %v1315_v55 }
0x1249   :  { %1142 = vmatpush.bf16.msra.mxu1 %v1314_v62 }
0x12c1   :  { %v663_v5 = vpop.f32.mrf.mxu1 }
0x12c2   :  { %v664_v6 = vadd.f32 %v1330_v4, %v663_v5 }
0x12c4   :  { %668 = vst [vmem:[#allocation4] sm:$0xff] %v664_v6 }
0x12c9   :  { %v665_v8 = vpop.f32.mrf.mxu1 }
0x12ca   :  { %v666_v9 = vadd.f32 %v1330_v4, %v665_v8 }
0x12cb   :  { %v674_v10 = vld [vmem:[#allocation4] sm:$0x3]  ;;  %v743_v39 = vld [vmem:[#allocation4 + $0x2] sm:$0x3]  ;;  %v807_v0 = vld [vmem:[#allocation4 + $0x4] sm:$0x3] }
0x12cc   :  { %v700_v11 = vadd.f32 %v696_v3, %v674_v10  ;;  %669 = vst [vmem:[#allocation4 + $0x8] sm:$0xff] %v666_v9 }
0x12ce   :  { %1395 = vtanh.f32 %v700_v11  ;;  %v1295_v13 = vmul.f32 -1.442695, %v700_v11 }
0x12d0   :  { %1397 = vpow2.f32 %v1295_v13 }
0x12d4   :  { %v1396_v12 = vpop.eup %1395 }
0x12d5   :  { %723 = vrot.lane.b32.xlu0 %v1396_v12, %s1588_s17 }
0x12d6   :  { %v1398_v14 = vpop.eup %1397 }
0x12d7   :  { %v704_v15 = vadd.f32 1.0, %v1398_v14 }
0x12d9   :  { %1399 = vrcp.f32 %v704_v15  ;;  %v716_v21 = vand.u32 2147483648, %v704_v15  ;;  %vm710_vm7 = vweird.f32 %v704_v15  ;;  %v714_v22 = vand.u32 2147483647, %v704_v15 }
0x12db   :  { %v717_v24 = vor.u32 1.1754944e-38, %v716_v21  ;;  %vm715_vm9 = vcmp.eq.f32.partialorder %v714_v22, 8.507059e+37 }
0x12df   :  { %v1400_v16 = vpop.eup %1399 }
0x12e0   :  { %v706_v17 = vmul.f32 %v1400_v16, %v704_v15  ;;  %vm711_vm5 = vweird.f32 %v1400_v16 }
0x12e1   :  { %vm712_vm8 = vmor %vm710_vm7, %vm711_vm5 }
0x12e2   :  { %v707_v18 = vsub.f32 1.0, %v706_v17 }
0x12e4   :  { %v708_v19 = vmul.f32 %v1400_v16, %v707_v18 }
0x12e6   :  { %v709_v20 = vadd.f32 %v1400_v16, %v708_v19 }
0x12e8   :  { %v713_v23 = vsel %vm712_vm8, %v1400_v16, %v709_v20 }
0x12e9   :  { %v718_v27 = vsel %vm715_vm9, %v717_v24, %v713_v23 }
0x12ea   :  { %v721_v29 = vmul.f32 0.0, %v718_v27 }
0x1347   :  { %v724_v25 = vpop.permute.xlu0 %723 }
0x1348   :  { %v726_v28 = vmul.f32 %v724_v25, %v718_v27 }
0x134a   :  { %728 = vrot.lane.b32.xlu1 %v726_v28, %s1592_s2 }
0x13bc   :  { %v729_v30 = vpop.permute.xlu1 %728 }
0x13bd   :  { %v731_v32 = vadd.f32 %v729_v30, %v721_v29  ;;  %v871_v30 = vld [vmem:[#allocation4 + $0x6] sm:$0x3] }
0x13bf   :  { %1401 = vtanh.f32 %v731_v32 }
0x13c5   :  { %v1402_v33 = vpop.eup %1401 }
0x13c6   :  { %734 = vrot.lane.b32.xlu2 %v1402_v33, %s1588_s17 }
0x1420   :  { %v735_v34 = vpop.permute.xlu2 %734 }
0x1421   :  { %v1775_v35 = vmul.f32 %v735_v34, %v718_v27 }
0x1423   :  { %v744_v36 = vpack.c.bf16 %v1775_v35, %v1775_v35 }
0x1425   :  { %746 = vrot.lane.b32.xlu0 %v744_v36, %s1592_s2 }
0x1497   :  { %v747_v37 = vpop.permute.xlu0 %746 }
0x1498   :  { %1296 = vmatmul.msk.bf16.vlgmr.msra.gmra.mxu3 %vm113_vm6, %v747_v37 }
0x151b   :  { %v760_v40 = vpop.f32.mrf.mxu3 }
0x151c   :  { %v764_v41 = vadd.f32 %v760_v40, %v743_v39 }
0x151e   :  { %1403 = vtanh.f32 %v764_v41  ;;  %v1297_v38 = vmul.f32 -1.442695, %v764_v41 }
0x1520   :  { %1405 = vpow2.f32 %v1297_v38 }
0x1523   :  { %v762_v42 = vpop.f32.mrf.mxu3 }
0x1524   :  { %v1404_v43 = vpop.eup %1403 }
0x1525   :  { %787 = vrot.lane.b32.xlu1 %v1404_v43, %s1588_s17 }
0x1526   :  { %v1406_v44 = vpop.eup %1405 }
0x1527   :  { %v768_v60 = vadd.f32 1.0, %v1406_v44 }
0x1529   :  { %1407 = vrcp.f32 %v768_v60  ;;  %v780_v50 = vand.u32 2147483648, %v768_v60  ;;  %vm774_vm11 = vweird.f32 %v768_v60  ;;  %v778_v51 = vand.u32 2147483647, %v768_v60 }
0x152b   :  { %v781_v54 = vor.u32 1.1754944e-38, %v780_v50  ;;  %vm779_vm13 = vcmp.eq.f32.partialorder %v778_v51, 8.507059e+37 }
0x152f   :  { %v1408_v45 = vpop.eup %1407 }
0x1530   :  { %v770_v46 = vmul.f32 %v1408_v45, %v768_v60  ;;  %vm775_vm10 = vweird.f32 %v1408_v45 }
0x1531   :  { %vm776_vm12 = vmor %vm774_vm11, %vm775_vm10 }
0x1532   :  { %v771_v47 = vsub.f32 1.0, %v770_v46 }
0x1534   :  { %v772_v48 = vmul.f32 %v1408_v45, %v771_v47 }
0x1536   :  { %v773_v49 = vadd.f32 %v1408_v45, %v772_v48 }
0x1538   :  { %v777_v53 = vsel %vm776_vm12, %v1408_v45, %v773_v49 }
0x1539   :  { %v782_v26 = vsel %vm779_vm13, %v781_v54, %v777_v53 }
0x153a   :  { %v785_v57 = vmul.f32 %v782_v26, %v731_v32 }
0x1597   :  { %v788_v2 = vpop.permute.xlu1 %787 }
0x1598   :  { %v790_v55 = vmul.f32 %v788_v2, %v782_v26 }
0x159a   :  { %792 = vrot.lane.b32.xlu2 %v790_v55, %s1592_s2 }
0x15f4   :  { %v793_v58 = vpop.permute.xlu2 %792 }
0x15f5   :  { %v795_v59 = vadd.f32 %v793_v58, %v785_v57 }
0x15f7   :  { %1409 = vtanh.f32 %v795_v59 }
0x15fd   :  { %v1410_v61 = vpop.eup %1409 }
0x15fe   :  { %798 = vrot.lane.b32.xlu0 %v1410_v61, %s1588_s17 }
0x1670   :  { %v799_v31 = vpop.permute.xlu0 %798 }
0x1671   :  { %v1784_v62 = vmul.f32 %v799_v31, %v782_v26 }
0x1673   :  { %v808_v56 = vpack.c.bf16 %v1784_v62, %v1784_v62 }
0x1675   :  { %810 = vrot.lane.b32.xlu1 %v808_v56, %s1592_s2 }
0x16e7   :  { %v811_v63 = vpop.permute.xlu1 %810 }
0x16e8   :  { %1298 = vmatmul.msk.bf16.vlgmr.msrb.gmra.mxu0 %vm113_vm6, %v811_v63 }
0x1765   :  { %v824_v1 = vpop.f32.mrf.mxu0 }
0x1766   :  { %v828_v3 = vadd.f32 %v824_v1, %v807_v0 }
0x1768   :  { %1411 = vtanh.f32 %v828_v3  ;;  %v1299_v5 = vmul.f32 -1.442695, %v828_v3 }
0x176a   :  { %1413 = vpow2.f32 %v1299_v5 }
0x176d   :  { %v826_v7 = vpop.f32.mrf.mxu0 }
0x176e   :  { %v1412_v4 = vpop.eup %1411 }
0x176f   :  { %851 = vrot.lane.b32.xlu2 %v1412_v4, %s1588_s17 }
0x1770   :  { %v1414_v6 = vpop.eup %1413 }
0x1771   :  { %v832_v8 = vadd.f32 1.0, %v1414_v6 }
0x1773   :  { %1415 = vrcp.f32 %v832_v8  ;;  %v844_v14 = vand.u32 2147483648, %v832_v8  ;;  %vm838_vm15 = vweird.f32 %v832_v8  ;;  %v842_v15 = vand.u32 2147483647, %v832_v8 }
0x1775   :  { %v845_v17 = vor.u32 1.1754944e-38, %v844_v14  ;;  %vm843_vm1 = vcmp.eq.f32.partialorder %v842_v15, 8.507059e+37 }
0x1779   :  { %v1416_v9 = vpop.eup %1415 }
0x177a   :  { %v834_v10 = vmul.f32 %v1416_v9, %v832_v8  ;;  %vm839_vm14 = vweird.f32 %v1416_v9 }
0x177b   :  { %vm840_vm0 = vmor %vm838_vm15, %vm839_vm14 }
0x177c   :  { %v835_v11 = vsub.f32 1.0, %v834_v10 }
0x177e   :  { %v836_v12 = vmul.f32 %v1416_v9, %v835_v11 }
0x1780   :  { %v837_v13 = vadd.f32 %v1416_v9, %v836_v12 }
0x1782   :  { %v841_v16 = vsel %vm840_vm0, %v1416_v9, %v837_v13 }
0x1783   :  { %v846_v19 = vsel %vm843_vm1, %v845_v17, %v841_v16 }
0x1784   :  { %v849_v21 = vmul.f32 %v846_v19, %v795_v59  ;;  %v935_v59 = vld [vmem:[#allocation4 + $0x8] sm:$0x3] }
0x17c9   :  { %v852_v18 = vpop.permute.xlu2 %851 }
0x17ca   :  { %v854_v20 = vmul.f32 %v852_v18, %v846_v19 }
0x17cc   :  { %856 = vrot.lane.b32.xlu0 %v854_v20, %s1592_s2 }
0x183e   :  { %v857_v22 = vpop.permute.xlu0 %856 }
0x183f   :  { %v859_v23 = vadd.f32 %v857_v22, %v849_v21 }
0x1841   :  { %1417 = vtanh.f32 %v859_v23 }
0x1847   :  { %v1418_v24 = vpop.eup %1417 }
0x1848   :  { %862 = vrot.lane.b32.xlu1 %v1418_v24, %s1588_s17  ;;  %v999_v24 = vld [vmem:[#allocation4 + $0xa] sm:$0x3] }
0x18ba   :  { %v863_v25 = vpop.permute.xlu1 %862 }
0x18bb   :  { %v1793_v27 = vmul.f32 %v863_v25, %v846_v19 }
0x18bd   :  { %v872_v28 = vpack.c.bf16 %v1793_v27, %v1793_v27 }
0x18bf   :  { %874 = vrot.lane.b32.xlu2 %v872_v28, %s1592_s2 }
0x1919   :  { %v875_v29 = vpop.permute.xlu2 %874 }
0x191a   :  { %1300 = vmatmul.msk.bf16.vlgmr.msrb.gmra.mxu1 %vm113_vm6, %v875_v29 }
0x1997   :  { %v888_v32 = vpop.f32.mrf.mxu1 }
0x1998   :  { %v892_v33 = vadd.f32 %v888_v32, %v871_v30 }
0x199a   :  { %1419 = vtanh.f32 %v892_v33  ;;  %v1301_v37 = vmul.f32 -1.442695, %v892_v33 }
0x199c   :  { %1421 = vpow2.f32 %v1301_v37 }
0x199f   :  { %v890_v34 = vpop.f32.mrf.mxu1 }
0x19a0   :  { %v1420_v36 = vpop.eup %1419 }
0x19a1   :  { %915 = vrot.lane.b32.xlu0 %v1420_v36, %s1588_s17 }
0x19a2   :  { %v1422_v39 = vpop.eup %1421 }
0x19a3   :  { %v896_v40 = vadd.f32 1.0, %v1422_v39 }
0x19a5   :  { %1423 = vrcp.f32 %v896_v40  ;;  %v908_v60 = vand.u32 2147483648, %v896_v40  ;;  %vm902_vm3 = vweird.f32 %v896_v40  ;;  %v906_v45 = vand.u32 2147483647, %v896_v40 }
0x19a7   :  { %v909_v47 = vor.u32 1.1754944e-38, %v908_v60  ;;  %vm907_vm7 = vcmp.eq.f32.partialorder %v906_v45, 8.507059e+37 }
0x19ab   :  { %v1424_v41 = vpop.eup %1423 }
0x19ac   :  { %v898_v42 = vmul.f32 %v1424_v41, %v896_v40  ;;  %vm903_vm2 = vweird.f32 %v1424_v41 }
0x19ad   :  { %vm904_vm5 = vmor %vm902_vm3, %vm903_vm2 }
0x19ae   :  { %v899_v43 = vsub.f32 1.0, %v898_v42 }
0x19b0   :  { %v900_v38 = vmul.f32 %v1424_v41, %v899_v43 }
0x19b2   :  { %v901_v44 = vadd.f32 %v1424_v41, %v900_v38 }
0x19b4   :  { %v905_v46 = vsel %vm904_vm5, %v1424_v41, %v901_v44 }
0x19b5   :  { %v910_v49 = vsel %vm907_vm7, %v909_v47, %v905_v46 }
0x19b6   :  { %v913_v51 = vmul.f32 %v910_v49, %v859_v23 }
0x1a13   :  { %v916_v48 = vpop.permute.xlu0 %915 }
0x1a14   :  { %v918_v50 = vmul.f32 %v916_v48, %v910_v49 }
0x1a16   :  { %920 = vrot.lane.b32.xlu1 %v918_v50, %s1592_s2 }
0x1a88   :  { %v921_v53 = vpop.permute.xlu1 %920 }
0x1a89   :  { %v923_v54 = vadd.f32 %v921_v53, %v913_v51 }
0x1a8b   :  { %1425 = vtanh.f32 %v923_v54 }
0x1a91   :  { %v1426_v2 = vpop.eup %1425 }
0x1a92   :  { %926 = vrot.lane.b32.xlu2 %v1426_v2, %s1588_s17 }
0x1aec   :  { %v927_v26 = vpop.permute.xlu2 %926 }
0x1aed   :  { %v1802_v55 = vmul.f32 %v927_v26, %v910_v49  ;;  %v1063_v26 = vld [vmem:[#allocation4 + $0xc] sm:$0x3] }
0x1aef   :  { %v936_v57 = vpack.c.bf16 %v1802_v55, %v1802_v55 }
0x1af1   :  { %938 = vrot.lane.b32.xlu0 %v936_v57, %s1592_s2 }
0x1b63   :  { %v939_v58 = vpop.permute.xlu0 %938 }
0x1b64   :  { %1302 = vmatmul.msk.bf16.vlgmr.msrb.gmra.mxu2 %vm113_vm6, %v939_v58 }
0x1be7   :  { %v952_v61 = vpop.f32.mrf.mxu2 }
0x1be8   :  { %v956_v31 = vadd.f32 %v952_v61, %v935_v59 }
0x1bea   :  { %1427 = vtanh.f32 %v956_v31  ;;  %v1303_v0 = vmul.f32 -1.442695, %v956_v31 }
0x1bec   :  { %1429 = vpow2.f32 %v1303_v0 }
0x1bef   :  { %v954_v56 = vpop.f32.mrf.mxu2 }
0x1bf0   :  { %v1428_v63 = vpop.eup %1427 }
0x1bf1   :  { %979 = vrot.lane.b32.xlu1 %v1428_v63, %s1588_s17 }
0x1bf2   :  { %v1430_v1 = vpop.eup %1429 }
0x1bf3   :  { %v960_v3 = vadd.f32 1.0, %v1430_v1 }
0x1bf5   :  { %1431 = vrcp.f32 %v960_v3  ;;  %v972_v9 = vand.u32 2147483648, %v960_v3  ;;  %vm966_vm9 = vweird.f32 %v960_v3  ;;  %v970_v10 = vand.u32 2147483647, %v960_v3 }
0x1bf7   :  { %v973_v12 = vor.u32 1.1754944e-38, %v972_v9  ;;  %vm971_vm11 = vcmp.eq.f32.partialorder %v970_v10, 8.507059e+37 }
0x1bfb   :  { %v1432_v7 = vpop.eup %1431 }
0x1bfc   :  { %v962_v4 = vmul.f32 %v1432_v7, %v960_v3  ;;  %vm967_vm8 = vweird.f32 %v1432_v7 }
0x1bfd   :  { %vm968_vm10 = vmor %vm966_vm9, %vm967_vm8 }
0x1bfe   :  { %v963_v5 = vsub.f32 1.0, %v962_v4 }
0x1c00   :  { %v964_v6 = vmul.f32 %v1432_v7, %v963_v5 }
0x1c02   :  { %v965_v8 = vadd.f32 %v1432_v7, %v964_v6 }
0x1c04   :  { %v969_v11 = vsel %vm968_vm10, %v1432_v7, %v965_v8 }
0x1c05   :  { %v974_v14 = vsel %vm971_vm11, %v973_v12, %v969_v11 }
0x1c06   :  { %v977_v16 = vmul.f32 %v974_v14, %v923_v54 }
0x1c63   :  { %v980_v13 = vpop.permute.xlu1 %979 }
0x1c64   :  { %v982_v15 = vmul.f32 %v980_v13, %v974_v14 }
0x1c66   :  { %984 = vrot.lane.b32.xlu2 %v982_v15, %s1592_s2 }
0x1cc0   :  { %v985_v17 = vpop.permute.xlu2 %984 }
0x1cc1   :  { %v987_v18 = vadd.f32 %v985_v17, %v977_v16 }
0x1cc3   :  { %1433 = vtanh.f32 %v987_v18 }
0x1cc9   :  { %v1434_v19 = vpop.eup %1433 }
0x1cca   :  { %990 = vrot.lane.b32.xlu0 %v1434_v19, %s1588_s17 }
0x1d3c   :  { %v991_v20 = vpop.permute.xlu0 %990 }
0x1d3d   :  { %v1811_v21 = vmul.f32 %v991_v20, %v974_v14 }
0x1d3f   :  { %v1000_v22 = vpack.c.bf16 %v1811_v21, %v1811_v21 }
0x1d41   :  { %1002 = vrot.lane.b32.xlu1 %v1000_v22, %s1592_s2  ;;  %v1127_v22 = vld [vmem:[#allocation4 + $0xe] sm:$0x3] }
0x1db3   :  { %v1003_v23 = vpop.permute.xlu1 %1002 }
0x1db4   :  { %1304 = vmatmul.msk.bf16.vlgmr.msrb.gmra.mxu3 %vm113_vm6, %v1003_v23 }
0x1e37   :  { %v1016_v25 = vpop.f32.mrf.mxu3 }
0x1e38   :  { %v1020_v28 = vadd.f32 %v1016_v25, %v999_v24 }
0x1e3a   :  { %1435 = vtanh.f32 %v1020_v28  ;;  %v1305_v32 = vmul.f32 -1.442695, %v1020_v28 }
0x1e3c   :  { %1437 = vpow2.f32 %v1305_v32 }
0x1e3f   :  { %v1018_v29 = vpop.f32.mrf.mxu3 }
0x1e40   :  { %v1436_v30 = vpop.eup %1435 }
0x1e41   :  { %1043 = vrot.lane.b32.xlu2 %v1436_v30, %s1588_s17 }
0x1e42   :  { %v1438_v33 = vpop.eup %1437 }
0x1e43   :  { %v1024_v34 = vadd.f32 1.0, %v1438_v33 }
0x1e45   :  { %1439 = vrcp.f32 %v1024_v34  ;;  %v1036_v42 = vand.u32 2147483648, %v1024_v34  ;;  %vm1030_vm13 = vweird.f32 %v1024_v34  ;;  %v1034_v43 = vand.u32 2147483647, %v1024_v34 }
0x1e47   :  { %v1037_v44 = vor.u32 1.1754944e-38, %v1036_v42  ;;  %vm1035_vm15 = vcmp.eq.f32.partialorder %v1034_v43, 8.507059e+37 }
0x1e4b   :  { %v1440_v36 = vpop.eup %1439 }
0x1e4c   :  { %v1026_v37 = vmul.f32 %v1440_v36, %v1024_v34  ;;  %vm1031_vm12 = vweird.f32 %v1440_v36 }
0x1e4d   :  { %vm1032_vm14 = vmor %vm1030_vm13, %vm1031_vm12 }
0x1e4e   :  { %v1027_v39 = vsub.f32 1.0, %v1026_v37 }
0x1e50   :  { %v1028_v40 = vmul.f32 %v1440_v36, %v1027_v39 }
0x1e52   :  { %v1029_v41 = vadd.f32 %v1440_v36, %v1028_v40 }
0x1e54   :  { %v1033_v38 = vsel %vm1032_vm14, %v1440_v36, %v1029_v41 }
0x1e55   :  { %v1038_v45 = vsel %vm1035_vm15, %v1037_v44, %v1033_v38 }
0x1e56   :  { %v1041_v47 = vmul.f32 %v1038_v45, %v987_v18 }
0x1e9b   :  { %v1044_v60 = vpop.permute.xlu2 %1043 }
0x1e9c   :  { %v1046_v46 = vmul.f32 %v1044_v60, %v1038_v45 }
0x1e9e   :  { %1048 = vrot.lane.b32.xlu0 %v1046_v46, %s1592_s2 }
0x1f10   :  { %v1049_v48 = vpop.permute.xlu0 %1048 }
0x1f11   :  { %v1051_v49 = vadd.f32 %v1049_v48, %v1041_v47 }
0x1f13   :  { %1441 = vtanh.f32 %v1051_v49 }
0x1f19   :  { %v1442_v50 = vpop.eup %1441 }
0x1f1a   :  { %1054 = vrot.lane.b32.xlu1 %v1442_v50, %s1588_s17 }
0x1f8c   :  { %v1055_v51 = vpop.permute.xlu1 %1054 }
0x1f8d   :  { %v1820_v53 = vmul.f32 %v1055_v51, %v1038_v45 }
0x1f8f   :  { %v1064_v54 = vpack.c.bf16 %v1820_v53, %v1820_v53 }
0x1f91   :  { %1066 = vrot.lane.b32.xlu2 %v1064_v54, %s1592_s2 }
0x1feb   :  { %v1067_v2 = vpop.permute.xlu2 %1066 }
0x1fec   :  { %1306 = vmatmul.msk.bf16.vlgmr.msra.gmra.mxu0 %vm113_vm6, %v1067_v2 }
0x2069   :  { %v1080_v57 = vpop.f32.mrf.mxu0 }
0x206a   :  { %v1084_v58 = vadd.f32 %v1080_v57, %v1063_v26 }
0x206c   :  { %1443 = vtanh.f32 %v1084_v58  ;;  %v1307_v31 = vmul.f32 -1.442695, %v1084_v58 }
0x206e   :  { %1445 = vpow2.f32 %v1307_v31 }
0x2071   :  { %v1082_v59 = vpop.f32.mrf.mxu0 }
0x2072   :  { %v1444_v61 = vpop.eup %1443 }
0x2073   :  { %1107 = vrot.lane.b32.xlu0 %v1444_v61, %s1588_s17 }
0x2074   :  { %v1446_v56 = vpop.eup %1445 }
0x2075   :  { %v1088_v63 = vadd.f32 1.0, %v1446_v56 }
0x2077   :  { %1447 = vrcp.f32 %v1088_v63  ;;  %v1100_v5 = vand.u32 2147483648, %v1088_v63  ;;  %vm1094_vm1 = vweird.f32 %v1088_v63  ;;  %v1098_v6 = vand.u32 2147483647, %v1088_v63 }
0x2079   :  { %v1101_v9 = vor.u32 1.1754944e-38, %v1100_v5  ;;  %vm1099_vm3 = vcmp.eq.f32.partialorder %v1098_v6, 8.507059e+37 }
0x207d   :  { %v1448_v0 = vpop.eup %1447 }
0x207e   :  { %v1090_v1 = vmul.f32 %v1448_v0, %v1088_v63  ;;  %vm1095_vm0 = vweird.f32 %v1448_v0 }
0x207f   :  { %vm1096_vm2 = vmor %vm1094_vm1, %vm1095_vm0 }
0x2080   :  { %v1091_v3 = vsub.f32 1.0, %v1090_v1 }
0x2082   :  { %v1092_v7 = vmul.f32 %v1448_v0, %v1091_v3 }
0x2084   :  { %v1093_v4 = vadd.f32 %v1448_v0, %v1092_v7 }
0x2086   :  { %v1097_v8 = vsel %vm1096_vm2, %v1448_v0, %v1093_v4 }
0x2087   :  { %v1102_v11 = vsel %vm1099_vm3, %v1101_v9, %v1097_v8 }
0x2088   :  { %v1105_v13 = vmul.f32 %v1102_v11, %v1051_v49 }
0x20e5   :  { %v1108_v10 = vpop.permute.xlu0 %1107 }
0x20e6   :  { %v1110_v12 = vmul.f32 %v1108_v10, %v1102_v11 }
0x20e8   :  { %1112 = vrot.lane.b32.xlu1 %v1110_v12, %s1592_s2 }
0x215a   :  { %v1113_v14 = vpop.permute.xlu1 %1112 }
0x215b   :  { %v1115_v15 = vadd.f32 %v1113_v14, %v1105_v13 }
0x215d   :  { %1449 = vtanh.f32 %v1115_v15 }
0x2163   :  { %v1450_v16 = vpop.eup %1449 }
0x2164   :  { %1118 = vrot.lane.b32.xlu2 %v1450_v16, %s1588_s17 }
0x21be   :  { %v1119_v17 = vpop.permute.xlu2 %1118 }
0x21bf   :  { %v1121_v18 = vmul.f32 %v1119_v17, %v1102_v11 }
0x21c1   :  { %v1128_v19 = vpack.c.bf16 %v1121_v18, %v1121_v18 }
0x21c3   :  { %1130 = vrot.lane.b32.xlu0 %v1128_v19, %s1592_s2 }
0x2235   :  { %v1131_v20 = vpop.permute.xlu0 %1130 }
0x2236   :  { %1308 = vmatmul.msk.bf16.vlgmr.msra.gmra.mxu1 %vm113_vm6, %v1131_v20 }
0x22b3   :  { %v1144_v23 = vpop.f32.mrf.mxu1 }
0x22b4   :  { %v1148_v24 = vadd.f32 %v1144_v23, %v1127_v22 }
0x22b6   :  { %1451 = vtanh.f32 %v1148_v24  ;;  %v1309_v29 = vmul.f32 -1.442695, %v1148_v24 }
0x22b8   :  { %1453 = vpow2.f32 %v1309_v29 }
0x22bb   :  { %v1146_v25 = vpop.f32.mrf.mxu1 }
0x22bc   :  { %v1452_v28 = vpop.eup %1451 }
0x22bd   :  { %1171 = vrot.lane.b32.xlu1 %v1452_v28, %s1588_s17 }
0x22be   :  { %v1454_v30 = vpop.eup %1453 }
0x22bf   :  { %v1152_v32 = vadd.f32 1.0, %v1454_v30 }
0x22c1   :  { %1455 = vrcp.f32 %v1152_v32  ;;  %v1164_v40 = vand.u32 2147483648, %v1152_v32  ;;  %vm1158_vm5 = vweird.f32 %v1152_v32  ;;  %v1162_v41 = vand.u32 2147483647, %v1152_v32 }
0x22c3   :  { %vm1163_vm8 = vcmp.eq.f32.partialorder %v1162_v41, 8.507059e+37 }
0x22c5   :  { %803 = vrot.lane.b32.xlu1 %v1784_v62, %s1592_s2  ;;  %v1165_v62 = vor.u32 1.1754944e-38, %v1164_v40 }
0x22c7   :  { %v1456_v33 = vpop.eup %1455 }
0x22c8   :  { %v1154_v34 = vmul.f32 %v1456_v33, %v1152_v32  ;;  %vm1159_vm6 = vweird.f32 %v1456_v33 }
0x22c9   :  { %vm1160_vm7 = vmor %vm1158_vm5, %vm1159_vm6 }
0x22ca   :  { %v1155_v36 = vsub.f32 1.0, %v1154_v34 }
0x22cc   :  { %v1156_v37 = vmul.f32 %v1456_v33, %v1155_v36 }
0x22cd   :  { %995 = vrot.lane.b32.xlu1 %v1811_v21, %s1592_s2 }
0x22ce   :  { %v1157_v39 = vadd.f32 %v1456_v33, %v1156_v37 }
0x22d0   :  { %v1161_v42 = vsel %vm1160_vm7, %v1456_v33, %v1157_v39 }
0x22d1   :  { %v1166_v21 = vsel %vm1163_vm8, %v1165_v62, %v1161_v42 }
0x22d2   :  { %v1169_v45 = vmul.f32 %v1166_v21, %v1115_v15 }
0x232f   :  { %v1172_v43 = vpop.permute.xlu1 %1171 }
0x2330   :  { %v1174_v38 = vmul.f32 %v1172_v43, %v1166_v21 }
0x2332   :  { %1176 = vrot.lane.b32.xlu2 %v1174_v38, %s1592_s2 }
0x2337   :  { %v804_v44 = vpop.permute.xlu1 %803 }
0x2338   :  { %806 = vst.msk [vmem:[#allocation10 + $0x2] sm:$0x3] %vm172_vm4, %v804_v44 }
0x233a   :  { %624 = vrot.lane.b32.xlu2 %v1752_v52, %s1593_s6 }
0x233f   :  { %v996_v60 = vpop.permute.xlu1 %995 }
0x2340   :  { %998 = vst.msk [vmem:[#allocation10 + $0x8] sm:$0x3] %vm172_vm4, %v996_v60 }
0x2342   :  { %867 = vrot.lane.b32.xlu2 %v1793_v27, %s1592_s2 }
0x234a   :  { %1059 = vrot.lane.b32.xlu2 %v1820_v53, %s1592_s2 }
0x238c   :  { %v1177_v46 = vpop.permute.xlu2 %1176 }
0x238d   :  { %v1179_v47 = vadd.f32 %v1177_v46, %v1169_v45 }
0x238f   :  { %1457 = vtanh.f32 %v1179_v47 }
0x2394   :  { %v625_v48 = vpop.permute.xlu2 %624 }
0x2395   :  { %v1458_v49 = vpop.eup %1457  ;;  %627 = vst.msk [vmem:[#allocation13] sm:$0x3] %vm172_vm4, %v625_v48 }
0x2396   :  { %1182 = vrot.lane.b32.xlu0 %v1458_v49, %s1588_s17 }
0x239c   :  { %v868_v52 = vpop.permute.xlu2 %867 }
0x239d   :  { %870 = vst.msk [vmem:[#allocation10 + $0x4] sm:$0x3] %vm172_vm4, %v868_v52 }
0x239e   :  { %739 = vrot.lane.b32.xlu0 %v1775_v35, %s1592_s2 }
0x23a4   :  { %v1060_v27 = vpop.permute.xlu2 %1059 }
0x23a5   :  { %1062 = vst.msk [vmem:[#allocation10 + $0xa] sm:$0x3] %vm172_vm4, %v1060_v27 }
0x23a6   :  { %931 = vrot.lane.b32.xlu0 %v1802_v55, %s1592_s2 }
0x23ae   :  { %1123 = vrot.lane.b32.xlu0 %v1121_v18, %s1592_s2 }
0x2408   :  { %v1183_v50 = vpop.permute.xlu0 %1182 }
0x2409   :  { %v1185_v51 = vmul.f32 %v1183_v50, %v1166_v21 }
0x240b   :  { %1187 = vrot.lane.b32.xlu1 %v1185_v51, %s1592_s2 }
0x2410   :  { %v740_v53 = vpop.permute.xlu0 %739 }
0x2411   :  { %742 = vst.msk [vmem:[#allocation10] sm:$0x3] %vm172_vm4, %v740_v53 }
0x2413   :  { %1194 = vrot.lane.b32.xlu1 %v1179_v47, %s1593_s6 }
0x2418   :  { %v932_v54 = vpop.permute.xlu0 %931 }
0x2419   :  { %934 = vst.msk [vmem:[#allocation10 + $0x6] sm:$0x3] %vm172_vm4, %v932_v54 }
0x2420   :  { %v1124_v35 = vpop.permute.xlu0 %1123 }
0x2421   :  { %1126 = vst.msk [vmem:[#allocation10 + $0xc] sm:$0x3] %vm172_vm4, %v1124_v35 }
0x247d   :  { %v1188_v55 = vpop.permute.xlu1 %1187 }
0x247e   :  { %1190 = vst.msk [vmem:[#allocation10 + $0xe] sm:$0x3] %vm172_vm4, %v1188_v55 }
0x247f   :  { %1192 = vst.msk [vmem:[#allocation11 + $0x2] sm:$0x3] %vm172_vm4, %v1188_v55  ;;  %1211 = dma.vmem_to_hbm [thread:$0]  %s1204_s12, 256, %s1206_s15, [#allocation7], %s1596_s19, %s1596_s19, %s1597_s20  }
0x2480   :  { %1224 = dma.vmem_to_hbm [thread:$0]  %s1217_s10, 64, %s1219_s18, [#allocation12], %s1592_s2, %s1592_s2, %s1598_s4  }
0x2485   :  { %v1195_v2 = vpop.permute.xlu1 %1194 }
0x2486   :  { %1198 = vst.msk [vmem:[#allocation13 + $0x2] sm:$0x3] %vm172_vm4, %v1195_v2 }
0x2487   :  { %1237 = dma.vmem_to_hbm [thread:$0]  %s1230_s21, 64, %s1232_s8, [#allocation12], %s1592_s2, %s1592_s2, %s1598_s4  }
0x2488   :  { %1583 = dma.done.wait [#allocation7], 256  }
0x2489   :  { %1584 = vsyncadd [#allocation7], 4294967040 }
0x248a   :  { %1585 = dma.done.wait [#allocation12], 128  }
0x248b   :  { %1586 = vsyncadd [#allocation12], 4294967168 }
0x248c   :  { %1250 = vsyncpa [#allocation6], 1 }
0x248d   :  { %1251 = vsyncpa [#allocation9], 1 }
0x248e   :  { %1252 = vsyncpa [#allocation7], 1 }
0x248f   :  { %1253 = vsyncpa [#allocation12], 1 }

</bundles_post_ra>
